<compile_context>
chip_gen: v7x
topology: tpu7x:2x2x1
jax: 0.10.0
libtpu: 0.0.40
codegen_flags: <defaults>
</compile_context>

<pallas_src>
import functools

import jax
import jax.numpy as jnp
from jax.experimental import pallas as pl
from jax.experimental.pallas import tpu as pltpu

DEPTH = 4
KH, KW = 2, 3
EPS = 1e-5


# ----------------------------------------------------------------------------
# Fused Pallas kernel: all layers of the dense block for one batch element.
# ----------------------------------------------------------------------------
def make_fused_kernel(T, F, C, depth):
    N = T * F                      # flattened spatial axis (lanes)
    Cmax = C * depth               # max input channels (last layer's skip width)
    maxd = 2 ** (depth - 1)        # largest dilation
    G = maxd * F + 1               # zeroed front margin = time padding for all layers
    L = G + N + 1                  # scratch lane length (1 trailing zero lane)

    def kernel(x_ref, w_ref, p_ref, o_ref, act_ref):
        # Zero the activation scratch: the margins act as the conv's zero padding
        # and not-yet-written channel rows must contribute 0 to the matmul.
        act_ref[...] = jnp.zeros((Cmax, L), jnp.float32)
        # Original input occupies the LAST C channel rows (concat order is
        # [x_i, x_{i-1}, ..., x_1, x_orig], newest first).
        act_ref[(depth - 1) * C:Cmax, G:G + N] = x_ref[0]

        # Lane masks for the frequency-edge taps (kw=0 reads f-1, kw=2 reads f+1;
        # those reads wrap across time rows in the flat layout and must be zeroed).
        fidx = jax.lax.broadcasted_iota(jnp.int32, (1, N), 1) % F
        mask_l = (fidx != 0).astype(jnp.float32)        # valid for kw = 0
        mask_r = (fidx != (F - 1)).astype(jnp.float32)  # valid for kw = 2

        for i in range(depth):                           # unrolled, static
            d = 2 ** i

            # ---- im2col: 6 shifted (Cmax, N) taps stacked along K ----
            taps = []
            for kh in range(KH):
                for kw in range(KW):
                    s = G + (kw - 1) - d * (1 - kh) * F  # static, always in-bounds
                    tap = act_ref[:, s:s + N]            # (Cmax, N)
                    if kw == 0:
                        tap = tap * mask_l
                    elif kw == 2:
                        tap = tap * mask_r
                    taps.append(tap)
            xcol = jnp.concatenate(taps, axis=0)         # (6*Cmax, N)

            # ---- single MXU matmul per layer: (C, 6*Cmax) @ (6*Cmax, N) ----
            acc = jnp.dot(w_ref[i], xcol,
                          preferred_element_type=jnp.float32)   # (C, N) f32

            # ---- packed per-channel params: bias, gamma, beta, alpha ----
            p = p_ref[i]                                  # (4*C, 1)
            b = p[0:C]
            g = p[C:2 * C]
            be = p[2 * C:3 * C]
            a = p[3 * C:4 * C]
            acc = acc + b

            # ---- InstanceNorm2d (biased var, affine): lane reductions ----
            mean = jnp.mean(acc, axis=1, keepdims=True)          # (C, 1)
            var = jnp.mean((acc - mean) ** 2, axis=1, keepdims=True)
            y = (acc - mean) * jax.lax.rsqrt(var + EPS) * g + be

            # ---- PReLU (per-channel alpha) ----
            y = jnp.where(y >= 0, y, a * y)

            if i < depth - 1:
                # dense concat: new output becomes the new "front" channels
                r = (depth - 2 - i) * C
                act_ref[r:r + C, G:G + N] = y
            else:
                o_ref[0] = y                              # lane-dense (C, 256) store

    return kernel, Cmax, L


# ----------------------------------------------------------------------------
# Wrapper: pack params once, single pallas_call over the batch.
# ----------------------------------------------------------------------------
def pack_params(params, C, depth=DEPTH):
    """Pack per-layer (w, b, gamma, beta, alpha) into fused-kernel layout."""
    Cmax = C * depth
    w_list, p_list = [], []
    for i in range(depth):
        w, b, gamma, beta, alpha = params[i]             # w: (KH, KW, Cin_i, C)
        cin = C * (i + 1)
        # Zero-pad input channels at the FRONT so weight channel c maps to
        # scratch row (depth-1-i)*C + c  (scratch rows = [x_i, ..., x_1, x_orig]).
        wp = jnp.pad(w, ((0, 0), (0, 0), (Cmax - cin, 0), (0, 0)))
        wp = jnp.transpose(wp, (3, 0, 1, 2)).reshape(C, KH * KW * Cmax)
        w_list.append(wp)
        p_list.append(jnp.concatenate([b, gamma, beta, alpha]).reshape(4 * C, 1))
    return jnp.stack(w_list), jnp.stack(p_list)          # (depth,C,6Cmax),(depth,4C,1)


def dense_block_forward(x_nchw, w_all, p_all, *, C, depth=DEPTH):
    B, Cc, T, F = x_nchw.shape
    assert Cc == C
    N = T * F
    Cmax = C * depth
    kernel, Cmax, L = make_fused_kernel(T, F, C, depth)

    x_flat = x_nchw.reshape(B, C, N)                     # contiguous, free reshape

    out = pl.pallas_call(
        kernel,
        out_shape=jax.ShapeDtypeStruct((B, C, N), jnp.float32),
        grid=(B,),
        in_specs=[
            pl.BlockSpec((1, C, N), lambda b: (b, 0, 0)),
            pl.BlockSpec((depth, C, KH * KW * Cmax), lambda b: (0, 0, 0)),
            pl.BlockSpec((depth, 4 * C, 1), lambda b: (0, 0, 0)),
        ],
        out_specs=pl.BlockSpec((1, C, N), lambda b: (b, 0, 0)),
        scratch_shapes=[pltpu.VMEM((Cmax, L), jnp.float32)],
        compiler_params=pltpu.CompilerParams(dimension_semantics=("parallel",)),
    )(x_flat, w_all, p_all)

    return out.reshape(B, C, T, F)


# ----------------------------------------------------------------------------
# Deterministic parameter init (mirrors nn.Conv2d / InstanceNorm2d / PReLU inits)
# ----------------------------------------------------------------------------
def init_params(key, dense_channel, depth=DEPTH):
    params = []
    for i in range(depth):
        cin = dense_channel * (i + 1)
        key, k1, k2 = jax.random.split(key, 3)
        fan_in = cin * KH * KW
        bound = 1.0 / (fan_in ** 0.5)
        w = jax.random.uniform(
            k1, (KH, KW, cin, dense_channel),
            minval=-bound, maxval=bound, dtype=jnp.float32)
        b = jax.random.uniform(
            k2, (dense_channel,), minval=-bound, maxval=bound, dtype=jnp.float32)
        gamma = jnp.ones((dense_channel,), jnp.float32)          # InstanceNorm weight
        beta = jnp.zeros((dense_channel,), jnp.float32)          # InstanceNorm bias
        alpha = jnp.full((dense_channel,), 0.25, jnp.float32)    # PReLU default
        params.append((w, b, gamma, beta, alpha))
    return params


# ----------------------------------------------------------------------------
# Pure-JAX reference for correctness checking
# ----------------------------------------------------------------------------
def ref_layer(x_nchw, w, b, gamma, beta, alpha, d):
    xpad = jnp.pad(x_nchw, ((0, 0), (0, 0), (d, 0), (1, 1)))
    y = jax.lax.conv_general_dilated(
        xpad, w, window_strides=(1, 1), padding="VALID",
        rhs_dilation=(d, 1), dimension_numbers=("NCHW", "HWIO", "NCHW"))
    y = y + b.reshape(1, -1, 1, 1)
    mean = y.mean(axis=(2, 3), keepdims=True)
    var = ((y - mean) ** 2).mean(axis=(2, 3), keepdims=True)
    y = (y - mean) / jnp.sqrt(var + EPS)
    y = y * gamma.reshape(1, -1, 1, 1) + beta.reshape(1, -1, 1, 1)
    return jnp.where(y >= 0, y, alpha.reshape(1, -1, 1, 1) * y)


def ref_forward(x_nchw, params, depth=DEPTH):
    skip = x_nchw
    x = x_nchw
    for i in range(depth):
        d = 2 ** i
        w, b, gamma, beta, alpha = params[i]
        x = ref_layer(skip, w, b, gamma, beta, alpha, d)
        skip = jnp.concatenate([x, skip], axis=1)
    return x


if __name__ == "__main__":
    key = jax.random.PRNGKey(0)
    kx, kp = jax.random.split(key)

    B, C, T, F = 2, 4, 16, 16          # (batch, dense_channel, time, freq)
    x = jax.random.normal(kx, (B, C, T, F), dtype=jnp.float32)
    params = init_params(kp, C)
    w_all, p_all = pack_params(params, C, DEPTH)

    fwd = jax.jit(functools.partial(dense_block_forward, C=C, depth=DEPTH))
    out = jax.block_until_ready(fwd(x, w_all, p_all))

    ref = ref_forward(x, params)
    assert out.shape == (B, C, T, F), out.shape
    max_err = float(jnp.max(jnp.abs(out - ref)))
    assert jnp.allclose(out, ref, atol=1e-4, rtol=1e-3), max_err

    print("KERNEL_OK")
</pallas_src>

<mosaic_0001>
module attributes {stable_mosaic.version = 11 : i64} {
  func.func @kernel(%arg0: i32, %arg1: memref<1x4x256xf32, #tpu.memory_space<vmem>>, %arg2: memref<4x4x96xf32, #tpu.memory_space<vmem>>, %arg3: memref<4x16x1xf32, #tpu.memory_space<vmem>>, %arg4: memref<1x4x256xf32, #tpu.memory_space<vmem>>, %arg5: memref<16x386xf32, #tpu.memory_space<vmem>>) attributes {dimension_semantics = [#tpu.dimension_semantics<parallel>], iteration_bounds = array<i64: 2>, scalar_prefetch = 0 : i64, scratch_operands = 1 : i64, tpu.core_type = #tpu.core_type<tc>, window_params = [{transform_indices = @transform_0, window_bounds = array<i64: 1, 4, 256>}, {pipeline_mode = #tpu.pipeline_mode<synchronous>, transform_indices = @transform_1, window_bounds = array<i64: 4, 4, 96>}, {pipeline_mode = #tpu.pipeline_mode<synchronous>, transform_indices = @transform_2, window_bounds = array<i64: 4, 16, 1>}, {transform_indices = @transform_3, window_bounds = array<i64: 1, 4, 256>}]} {
    %cst = arith.constant 0.000000e+00 : f32
    %0 = vector.broadcast %cst : f32 to vector<16x386xf32>
    %c0 = arith.constant 0 : index
    %c0_0 = arith.constant 0 : index
    %1 = vector.load %arg5[%c0, %c0_0] : memref<16x386xf32, #tpu.memory_space<vmem>>, vector<16x386xf32>
    tpu.vector_store %arg5[%c0, %c0_0], %0 {strides = array<i32>} : memref<16x386xf32, #tpu.memory_space<vmem>>, vector<16x386xf32>,
    %c0_1 = arith.constant 0 : index
    %c0_2 = arith.constant 0 : index
    %c0_3 = arith.constant 0 : index
    %2 = vector.load %arg1[%c0_1, %c0_2, %c0_3] : memref<1x4x256xf32, #tpu.memory_space<vmem>>, vector<1x4x256xf32>
    %3 = vector.shape_cast %2 : vector<1x4x256xf32> to vector<4x256xf32>
    %c12 = arith.constant 12 : index
    %c129 = arith.constant 129 : index
    %4 = vector.load %arg5[%c12, %c129] : memref<16x386xf32, #tpu.memory_space<vmem>>, vector<4x256xf32>
    tpu.vector_store %arg5[%c12, %c129], %3 {strides = array<i32>} : memref<16x386xf32, #tpu.memory_space<vmem>>, vector<4x256xf32>,
    %5 = tpu.iota {dimensions = array<i32: 1>} : vector<1x256xi32>
    %c16_i32 = arith.constant 16 : i32
    %c0_i32 = arith.constant 0 : i32
    %6 = arith.cmpi eq, %c16_i32, %c0_i32 : i32
    %c1_i32 = arith.constant 1 : i32
    %7 = arith.select %6, %c1_i32, %c16_i32 : i32
    %8 = vector.broadcast %7 : i32 to vector<1x256xi32>
    %9 = arith.remsi %5, %8 : vector<1x256xi32>
    %c0_i32_4 = arith.constant 0 : i32
    %10 = vector.broadcast %c0_i32_4 : i32 to vector<1x256xi32>
    %11 = arith.cmpi ne, %9, %10 : vector<1x256xi32>
    %c0_i32_5 = arith.constant 0 : i32
    %12 = vector.broadcast %c0_i32_5 : i32 to vector<1x256xi32>
    %13 = arith.cmpi slt, %9, %12 : vector<1x256xi32>
    %c0_i32_6 = arith.constant 0 : i32
    %14 = arith.cmpi slt, %7, %c0_i32_6 : i32
    %15 = vector.broadcast %14 : i1 to vector<1x256xi1>
    %16 = vector.broadcast %15 : vector<1x256xi1> to vector<1x256xi1>
    %17 = arith.xori %13, %16 : vector<1x256xi1>
    %18 = arith.andi %17, %11 : vector<1x256xi1>
    %19 = vector.broadcast %7 : i32 to vector<1x256xi32>
    %20 = arith.addi %9, %19 : vector<1x256xi32>
    %21 = arith.select %18, %20, %9 : vector<1x256xi1>, vector<1x256xi32>
    %c0_i32_7 = arith.constant 0 : i32
    %22 = vector.broadcast %c0_i32_7 : i32 to vector<1x256xi32>
    %23 = arith.cmpi ne, %21, %22 : vector<1x256xi32>
    %24 = arith.extui %23 : vector<1x256xi1> to vector<1x256xi32>
    %25 = arith.sitofp %24 : vector<1x256xi32> to vector<1x256xf32>
    %c15_i32 = arith.constant 15 : i32
    %26 = vector.broadcast %c15_i32 : i32 to vector<1x256xi32>
    %27 = arith.cmpi ne, %21, %26 : vector<1x256xi32>
    %28 = arith.extui %27 : vector<1x256xi1> to vector<1x256xi32>
    %29 = arith.sitofp %28 : vector<1x256xi32> to vector<1x256xf32>
    %c0_8 = arith.constant 0 : index
    %c112 = arith.constant 112 : index
    %30 = vector.load %arg5[%c0_8, %c112] : memref<16x386xf32, #tpu.memory_space<vmem>>, vector<16x256xf32>
    %31 = vector.broadcast %25 : vector<1x256xf32> to vector<16x256xf32>
    %32 = arith.mulf %30, %31 : vector<16x256xf32>
    %c0_9 = arith.constant 0 : index
    %c113 = arith.constant 113 : index
    %33 = vector.load %arg5[%c0_9, %c113] : memref<16x386xf32, #tpu.memory_space<vmem>>, vector<16x256xf32>
    %c0_10 = arith.constant 0 : index
    %c114 = arith.constant 114 : index
    %34 = vector.load %arg5[%c0_10, %c114] : memref<16x386xf32, #tpu.memory_space<vmem>>, vector<16x256xf32>
    %35 = vector.broadcast %29 : vector<1x256xf32> to vector<16x256xf32>
    %36 = arith.mulf %34, %35 : vector<16x256xf32>
    %c0_11 = arith.constant 0 : index
    %c128 = arith.constant 128 : index
    %37 = vector.load %arg5[%c0_11, %c128] : memref<16x386xf32, #tpu.memory_space<vmem>>, vector<16x256xf32>
    %38 = vector.broadcast %25 : vector<1x256xf32> to vector<16x256xf32>
    %39 = arith.mulf %37, %38 : vector<16x256xf32>
    %c0_12 = arith.constant 0 : index
    %c129_13 = arith.constant 129 : index
    %40 = vector.load %arg5[%c0_12, %c129_13] : memref<16x386xf32, #tpu.memory_space<vmem>>, vector<16x256xf32>
    %c0_14 = arith.constant 0 : index
    %c130 = arith.constant 130 : index
    %41 = vector.load %arg5[%c0_14, %c130] : memref<16x386xf32, #tpu.memory_space<vmem>>, vector<16x256xf32>
    %42 = vector.broadcast %29 : vector<1x256xf32> to vector<16x256xf32>
    %43 = arith.mulf %41, %42 : vector<16x256xf32>
    %44 = tpu.concatenate %32, %33, %36, %39, %40, %43 in 0 : vector<16x256xf32>, vector<16x256xf32>, vector<16x256xf32>, vector<16x256xf32>, vector<16x256xf32>, vector<16x256xf32> -> vector<96x256xf32>
    %c0_15 = arith.constant 0 : index
    %c0_16 = arith.constant 0 : index
    %c0_17 = arith.constant 0 : index
    %45 = vector.load %arg2[%c0_15, %c0_16, %c0_17] : memref<4x4x96xf32, #tpu.memory_space<vmem>>, vector<1x4x96xf32>
    %46 = vector.shape_cast %45 : vector<1x4x96xf32> to vector<4x96xf32>
    %cst_18 = arith.constant dense<0.000000e+00> : vector<4x256xf32>
    %47 = tpu.matmul %46, %44, %cst_18 {dimension_numbers = #tpu.dot_dimension_numbers<[1], [0], [0], [1], [0, 0, 1, 1], [], []>} : vector<4x96xf32>, vector<96x256xf32>, vector<4x256xf32> -> vector<4x256xf32>
    %c0_19 = arith.constant 0 : index
    %c0_20 = arith.constant 0 : index
    %c0_21 = arith.constant 0 : index
    %48 = vector.load %arg3[%c0_19, %c0_20, %c0_21] : memref<4x16x1xf32, #tpu.memory_space<vmem>>, vector<1x16x1xf32>
    %49 = vector.shape_cast %48 : vector<1x16x1xf32> to vector<16x1xf32>
    %50 = vector.extract_strided_slice %49 {offsets = [0, 0], sizes = [4, 1], strides = [1, 1]} : vector<16x1xf32> to vector<4x1xf32>
    %51 = vector.extract_strided_slice %49 {offsets = [4, 0], sizes = [4, 1], strides = [1, 1]} : vector<16x1xf32> to vector<4x1xf32>
    %52 = vector.extract_strided_slice %49 {offsets = [8, 0], sizes = [4, 1], strides = [1, 1]} : vector<16x1xf32> to vector<4x1xf32>
    %53 = vector.extract_strided_slice %49 {offsets = [12, 0], sizes = [4, 1], strides = [1, 1]} : vector<16x1xf32> to vector<4x1xf32>
    %54 = vector.broadcast %50 : vector<4x1xf32> to vector<4x256xf32>
    %55 = arith.addf %47, %54 : vector<4x256xf32>
    %cst_22 = arith.constant dense<0.000000e+00> : vector<4xf32>
    %56 = vector.multi_reduction <add>, %55, %cst_22 [1] : vector<4x256xf32> to vector<4xf32>
    %57 = vector.shape_cast %56 : vector<4xf32> to vector<4x1xf32>
    %cst_23 = arith.constant 2.560000e+02 : f32
    %58 = vector.broadcast %cst_23 : f32 to vector<4x1xf32>
    %59 = arith.divf %57, %58 : vector<4x1xf32>
    %60 = vector.broadcast %59 : vector<4x1xf32> to vector<4x256xf32>
    %61 = arith.subf %55, %60 : vector<4x256xf32>
    %62 = arith.mulf %61, %61 : vector<4x256xf32>
    %cst_24 = arith.constant dense<0.000000e+00> : vector<4xf32>
    %63 = vector.multi_reduction <add>, %62, %cst_24 [1] : vector<4x256xf32> to vector<4xf32>
    %64 = vector.shape_cast %63 : vector<4xf32> to vector<4x1xf32>
    %cst_25 = arith.constant 2.560000e+02 : f32
    %65 = vector.broadcast %cst_25 : f32 to vector<4x1xf32>
    %66 = arith.divf %64, %65 : vector<4x1xf32>
    %67 = vector.broadcast %59 : vector<4x1xf32> to vector<4x256xf32>
    %68 = arith.subf %55, %67 : vector<4x256xf32>
    %cst_26 = arith.constant 9.99999974E-6 : f32
    %69 = vector.broadcast %cst_26 : f32 to vector<4x1xf32>
    %70 = arith.addf %66, %69 : vector<4x1xf32>
    %71 = math.rsqrt %70 : vector<4x1xf32>
    %72 = vector.broadcast %71 : vector<4x1xf32> to vector<4x256xf32>
    %73 = arith.mulf %68, %72 : vector<4x256xf32>
    %74 = vector.broadcast %51 : vector<4x1xf32> to vector<4x256xf32>
    %75 = arith.mulf %73, %74 : vector<4x256xf32>
    %76 = vector.broadcast %52 : vector<4x1xf32> to vector<4x256xf32>
    %77 = arith.addf %75, %76 : vector<4x256xf32>
    %cst_27 = arith.constant 0.000000e+00 : f32
    %78 = vector.broadcast %cst_27 : f32 to vector<4x256xf32>
    %79 = arith.cmpf oge, %77, %78 : vector<4x256xf32>
    %80 = vector.broadcast %53 : vector<4x1xf32> to vector<4x256xf32>
    %81 = arith.mulf %80, %77 : vector<4x256xf32>
    %82 = arith.select %79, %77, %81 : vector<4x256xi1>, vector<4x256xf32>
    %c8 = arith.constant 8 : index
    %c129_28 = arith.constant 129 : index
    %83 = vector.load %arg5[%c8, %c129_28] : memref<16x386xf32, #tpu.memory_space<vmem>>, vector<4x256xf32>
    tpu.vector_store %arg5[%c8, %c129_28], %82 {strides = array<i32>} : memref<16x386xf32, #tpu.memory_space<vmem>>, vector<4x256xf32>,
    %c0_29 = arith.constant 0 : index
    %c96 = arith.constant 96 : index
    %84 = vector.load %arg5[%c0_29, %c96] : memref<16x386xf32, #tpu.memory_space<vmem>>, vector<16x256xf32>
    %85 = vector.broadcast %25 : vector<1x256xf32> to vector<16x256xf32>
    %86 = arith.mulf %84, %85 : vector<16x256xf32>
    %c0_30 = arith.constant 0 : index
    %c97 = arith.constant 97 : index
    %87 = vector.load %arg5[%c0_30, %c97] : memref<16x386xf32, #tpu.memory_space<vmem>>, vector<16x256xf32>
    %c0_31 = arith.constant 0 : index
    %c98 = arith.constant 98 : index
    %88 = vector.load %arg5[%c0_31, %c98] : memref<16x386xf32, #tpu.memory_space<vmem>>, vector<16x256xf32>
    %89 = vector.broadcast %29 : vector<1x256xf32> to vector<16x256xf32>
    %90 = arith.mulf %88, %89 : vector<16x256xf32>
    %c0_32 = arith.constant 0 : index
    %c128_33 = arith.constant 128 : index
    %91 = vector.load %arg5[%c0_32, %c128_33] : memref<16x386xf32, #tpu.memory_space<vmem>>, vector<16x256xf32>
    %92 = vector.broadcast %25 : vector<1x256xf32> to vector<16x256xf32>
    %93 = arith.mulf %91, %92 : vector<16x256xf32>
    %c0_34 = arith.constant 0 : index
    %c129_35 = arith.constant 129 : index
    %94 = vector.load %arg5[%c0_34, %c129_35] : memref<16x386xf32, #tpu.memory_space<vmem>>, vector<16x256xf32>
    %c0_36 = arith.constant 0 : index
    %c130_37 = arith.constant 130 : index
    %95 = vector.load %arg5[%c0_36, %c130_37] : memref<16x386xf32, #tpu.memory_space<vmem>>, vector<16x256xf32>
    %96 = vector.broadcast %29 : vector<1x256xf32> to vector<16x256xf32>
    %97 = arith.mulf %95, %96 : vector<16x256xf32>
    %98 = tpu.concatenate %86, %87, %90, %93, %94, %97 in 0 : vector<16x256xf32>, vector<16x256xf32>, vector<16x256xf32>, vector<16x256xf32>, vector<16x256xf32>, vector<16x256xf32> -> vector<96x256xf32>
    %c1 = arith.constant 1 : index
    %c0_38 = arith.constant 0 : index
    %c0_39 = arith.constant 0 : index
    %99 = vector.load %arg2[%c1, %c0_38, %c0_39] : memref<4x4x96xf32, #tpu.memory_space<vmem>>, vector<1x4x96xf32>
    %100 = vector.shape_cast %99 : vector<1x4x96xf32> to vector<4x96xf32>
    %cst_40 = arith.constant dense<0.000000e+00> : vector<4x256xf32>
    %101 = tpu.matmul %100, %98, %cst_40 {dimension_numbers = #tpu.dot_dimension_numbers<[1], [0], [0], [1], [0, 0, 1, 1], [], []>} : vector<4x96xf32>, vector<96x256xf32>, vector<4x256xf32> -> vector<4x256xf32>
    %c1_41 = arith.constant 1 : index
    %c0_42 = arith.constant 0 : index
    %c0_43 = arith.constant 0 : index
    %102 = vector.load %arg3[%c1_41, %c0_42, %c0_43] : memref<4x16x1xf32, #tpu.memory_space<vmem>>, vector<1x16x1xf32>
    %103 = vector.shape_cast %102 : vector<1x16x1xf32> to vector<16x1xf32>
    %104 = vector.extract_strided_slice %103 {offsets = [0, 0], sizes = [4, 1], strides = [1, 1]} : vector<16x1xf32> to vector<4x1xf32>
    %105 = vector.extract_strided_slice %103 {offsets = [4, 0], sizes = [4, 1], strides = [1, 1]} : vector<16x1xf32> to vector<4x1xf32>
    %106 = vector.extract_strided_slice %103 {offsets = [8, 0], sizes = [4, 1], strides = [1, 1]} : vector<16x1xf32> to vector<4x1xf32>
    %107 = vector.extract_strided_slice %103 {offsets = [12, 0], sizes = [4, 1], strides = [1, 1]} : vector<16x1xf32> to vector<4x1xf32>
    %108 = vector.broadcast %104 : vector<4x1xf32> to vector<4x256xf32>
    %109 = arith.addf %101, %108 : vector<4x256xf32>
    %cst_44 = arith.constant dense<0.000000e+00> : vector<4xf32>
    %110 = vector.multi_reduction <add>, %109, %cst_44 [1] : vector<4x256xf32> to vector<4xf32>
    %111 = vector.shape_cast %110 : vector<4xf32> to vector<4x1xf32>
    %cst_45 = arith.constant 2.560000e+02 : f32
    %112 = vector.broadcast %cst_45 : f32 to vector<4x1xf32>
    %113 = arith.divf %111, %112 : vector<4x1xf32>
    %114 = vector.broadcast %113 : vector<4x1xf32> to vector<4x256xf32>
    %115 = arith.subf %109, %114 : vector<4x256xf32>
    %116 = arith.mulf %115, %115 : vector<4x256xf32>
    %cst_46 = arith.constant dense<0.000000e+00> : vector<4xf32>
    %117 = vector.multi_reduction <add>, %116, %cst_46 [1] : vector<4x256xf32> to vector<4xf32>
    %118 = vector.shape_cast %117 : vector<4xf32> to vector<4x1xf32>
    %cst_47 = arith.constant 2.560000e+02 : f32
    %119 = vector.broadcast %cst_47 : f32 to vector<4x1xf32>
    %120 = arith.divf %118, %119 : vector<4x1xf32>
    %121 = vector.broadcast %113 : vector<4x1xf32> to vector<4x256xf32>
    %122 = arith.subf %109, %121 : vector<4x256xf32>
    %cst_48 = arith.constant 9.99999974E-6 : f32
    %123 = vector.broadcast %cst_48 : f32 to vector<4x1xf32>
    %124 = arith.addf %120, %123 : vector<4x1xf32>
    %125 = math.rsqrt %124 : vector<4x1xf32>
    %126 = vector.broadcast %125 : vector<4x1xf32> to vector<4x256xf32>
    %127 = arith.mulf %122, %126 : vector<4x256xf32>
    %128 = vector.broadcast %105 : vector<4x1xf32> to vector<4x256xf32>
    %129 = arith.mulf %127, %128 : vector<4x256xf32>
    %130 = vector.broadcast %106 : vector<4x1xf32> to vector<4x256xf32>
    %131 = arith.addf %129, %130 : vector<4x256xf32>
    %cst_49 = arith.constant 0.000000e+00 : f32
    %132 = vector.broadcast %cst_49 : f32 to vector<4x256xf32>
    %133 = arith.cmpf oge, %131, %132 : vector<4x256xf32>
    %134 = vector.broadcast %107 : vector<4x1xf32> to vector<4x256xf32>
    %135 = arith.mulf %134, %131 : vector<4x256xf32>
    %136 = arith.select %133, %131, %135 : vector<4x256xi1>, vector<4x256xf32>
    %c4 = arith.constant 4 : index
    %c129_50 = arith.constant 129 : index
    %137 = vector.load %arg5[%c4, %c129_50] : memref<16x386xf32, #tpu.memory_space<vmem>>, vector<4x256xf32>
    tpu.vector_store %arg5[%c4, %c129_50], %136 {strides = array<i32>} : memref<16x386xf32, #tpu.memory_space<vmem>>, vector<4x256xf32>,
    %c0_51 = arith.constant 0 : index
    %c64 = arith.constant 64 : index
    %138 = vector.load %arg5[%c0_51, %c64] : memref<16x386xf32, #tpu.memory_space<vmem>>, vector<16x256xf32>
    %139 = vector.broadcast %25 : vector<1x256xf32> to vector<16x256xf32>
    %140 = arith.mulf %138, %139 : vector<16x256xf32>
    %c0_52 = arith.constant 0 : index
    %c65 = arith.constant 65 : index
    %141 = vector.load %arg5[%c0_52, %c65] : memref<16x386xf32, #tpu.memory_space<vmem>>, vector<16x256xf32>
    %c0_53 = arith.constant 0 : index
    %c66 = arith.constant 66 : index
    %142 = vector.load %arg5[%c0_53, %c66] : memref<16x386xf32, #tpu.memory_space<vmem>>, vector<16x256xf32>
    %143 = vector.broadcast %29 : vector<1x256xf32> to vector<16x256xf32>
    %144 = arith.mulf %142, %143 : vector<16x256xf32>
    %c0_54 = arith.constant 0 : index
    %c128_55 = arith.constant 128 : index
    %145 = vector.load %arg5[%c0_54, %c128_55] : memref<16x386xf32, #tpu.memory_space<vmem>>, vector<16x256xf32>
    %146 = vector.broadcast %25 : vector<1x256xf32> to vector<16x256xf32>
    %147 = arith.mulf %145, %146 : vector<16x256xf32>
    %c0_56 = arith.constant 0 : index
    %c129_57 = arith.constant 129 : index
    %148 = vector.load %arg5[%c0_56, %c129_57] : memref<16x386xf32, #tpu.memory_space<vmem>>, vector<16x256xf32>
    %c0_58 = arith.constant 0 : index
    %c130_59 = arith.constant 130 : index
    %149 = vector.load %arg5[%c0_58, %c130_59] : memref<16x386xf32, #tpu.memory_space<vmem>>, vector<16x256xf32>
    %150 = vector.broadcast %29 : vector<1x256xf32> to vector<16x256xf32>
    %151 = arith.mulf %149, %150 : vector<16x256xf32>
    %152 = tpu.concatenate %140, %141, %144, %147, %148, %151 in 0 : vector<16x256xf32>, vector<16x256xf32>, vector<16x256xf32>, vector<16x256xf32>, vector<16x256xf32>, vector<16x256xf32> -> vector<96x256xf32>
    %c2 = arith.constant 2 : index
    %c0_60 = arith.constant 0 : index
    %c0_61 = arith.constant 0 : index
    %153 = vector.load %arg2[%c2, %c0_60, %c0_61] : memref<4x4x96xf32, #tpu.memory_space<vmem>>, vector<1x4x96xf32>
    %154 = vector.shape_cast %153 : vector<1x4x96xf32> to vector<4x96xf32>
    %cst_62 = arith.constant dense<0.000000e+00> : vector<4x256xf32>
    %155 = tpu.matmul %154, %152, %cst_62 {dimension_numbers = #tpu.dot_dimension_numbers<[1], [0], [0], [1], [0, 0, 1, 1], [], []>} : vector<4x96xf32>, vector<96x256xf32>, vector<4x256xf32> -> vector<4x256xf32>
    %c2_63 = arith.constant 2 : index
    %c0_64 = arith.constant 0 : index
    %c0_65 = arith.constant 0 : index
    %156 = vector.load %arg3[%c2_63, %c0_64, %c0_65] : memref<4x16x1xf32, #tpu.memory_space<vmem>>, vector<1x16x1xf32>
    %157 = vector.shape_cast %156 : vector<1x16x1xf32> to vector<16x1xf32>
    %158 = vector.extract_strided_slice %157 {offsets = [0, 0], sizes = [4, 1], strides = [1, 1]} : vector<16x1xf32> to vector<4x1xf32>
    %159 = vector.extract_strided_slice %157 {offsets = [4, 0], sizes = [4, 1], strides = [1, 1]} : vector<16x1xf32> to vector<4x1xf32>
    %160 = vector.extract_strided_slice %157 {offsets = [8, 0], sizes = [4, 1], strides = [1, 1]} : vector<16x1xf32> to vector<4x1xf32>
    %161 = vector.extract_strided_slice %157 {offsets = [12, 0], sizes = [4, 1], strides = [1, 1]} : vector<16x1xf32> to vector<4x1xf32>
    %162 = vector.broadcast %158 : vector<4x1xf32> to vector<4x256xf32>
    %163 = arith.addf %155, %162 : vector<4x256xf32>
    %cst_66 = arith.constant dense<0.000000e+00> : vector<4xf32>
    %164 = vector.multi_reduction <add>, %163, %cst_66 [1] : vector<4x256xf32> to vector<4xf32>
    %165 = vector.shape_cast %164 : vector<4xf32> to vector<4x1xf32>
    %cst_67 = arith.constant 2.560000e+02 : f32
    %166 = vector.broadcast %cst_67 : f32 to vector<4x1xf32>
    %167 = arith.divf %165, %166 : vector<4x1xf32>
    %168 = vector.broadcast %167 : vector<4x1xf32> to vector<4x256xf32>
    %169 = arith.subf %163, %168 : vector<4x256xf32>
    %170 = arith.mulf %169, %169 : vector<4x256xf32>
    %cst_68 = arith.constant dense<0.000000e+00> : vector<4xf32>
    %171 = vector.multi_reduction <add>, %170, %cst_68 [1] : vector<4x256xf32> to vector<4xf32>
    %172 = vector.shape_cast %171 : vector<4xf32> to vector<4x1xf32>
    %cst_69 = arith.constant 2.560000e+02 : f32
    %173 = vector.broadcast %cst_69 : f32 to vector<4x1xf32>
    %174 = arith.divf %172, %173 : vector<4x1xf32>
    %175 = vector.broadcast %167 : vector<4x1xf32> to vector<4x256xf32>
    %176 = arith.subf %163, %175 : vector<4x256xf32>
    %cst_70 = arith.constant 9.99999974E-6 : f32
    %177 = vector.broadcast %cst_70 : f32 to vector<4x1xf32>
    %178 = arith.addf %174, %177 : vector<4x1xf32>
    %179 = math.rsqrt %178 : vector<4x1xf32>
    %180 = vector.broadcast %179 : vector<4x1xf32> to vector<4x256xf32>
    %181 = arith.mulf %176, %180 : vector<4x256xf32>
    %182 = vector.broadcast %159 : vector<4x1xf32> to vector<4x256xf32>
    %183 = arith.mulf %181, %182 : vector<4x256xf32>
    %184 = vector.broadcast %160 : vector<4x1xf32> to vector<4x256xf32>
    %185 = arith.addf %183, %184 : vector<4x256xf32>
    %cst_71 = arith.constant 0.000000e+00 : f32
    %186 = vector.broadcast %cst_71 : f32 to vector<4x256xf32>
    %187 = arith.cmpf oge, %185, %186 : vector<4x256xf32>
    %188 = vector.broadcast %161 : vector<4x1xf32> to vector<4x256xf32>
    %189 = arith.mulf %188, %185 : vector<4x256xf32>
    %190 = arith.select %187, %185, %189 : vector<4x256xi1>, vector<4x256xf32>
    %c0_72 = arith.constant 0 : index
    %c129_73 = arith.constant 129 : index
    %191 = vector.load %arg5[%c0_72, %c129_73] : memref<16x386xf32, #tpu.memory_space<vmem>>, vector<4x256xf32>
    tpu.vector_store %arg5[%c0_72, %c129_73], %190 {strides = array<i32>} : memref<16x386xf32, #tpu.memory_space<vmem>>, vector<4x256xf32>,
    %c0_74 = arith.constant 0 : index
    %c0_75 = arith.constant 0 : index
    %192 = vector.load %arg5[%c0_74, %c0_75] : memref<16x386xf32, #tpu.memory_space<vmem>>, vector<16x256xf32>
    %193 = vector.broadcast %25 : vector<1x256xf32> to vector<16x256xf32>
    %194 = arith.mulf %192, %193 : vector<16x256xf32>
    %c0_76 = arith.constant 0 : index
    %c1_77 = arith.constant 1 : index
    %195 = vector.load %arg5[%c0_76, %c1_77] : memref<16x386xf32, #tpu.memory_space<vmem>>, vector<16x256xf32>
    %c0_78 = arith.constant 0 : index
    %c2_79 = arith.constant 2 : index
    %196 = vector.load %arg5[%c0_78, %c2_79] : memref<16x386xf32, #tpu.memory_space<vmem>>, vector<16x256xf32>
    %197 = vector.broadcast %29 : vector<1x256xf32> to vector<16x256xf32>
    %198 = arith.mulf %196, %197 : vector<16x256xf32>
    %c0_80 = arith.constant 0 : index
    %c128_81 = arith.constant 128 : index
    %199 = vector.load %arg5[%c0_80, %c128_81] : memref<16x386xf32, #tpu.memory_space<vmem>>, vector<16x256xf32>
    %200 = vector.broadcast %25 : vector<1x256xf32> to vector<16x256xf32>
    %201 = arith.mulf %199, %200 : vector<16x256xf32>
    %c0_82 = arith.constant 0 : index
    %c129_83 = arith.constant 129 : index
    %202 = vector.load %arg5[%c0_82, %c129_83] : memref<16x386xf32, #tpu.memory_space<vmem>>, vector<16x256xf32>
    %c0_84 = arith.constant 0 : index
    %c130_85 = arith.constant 130 : index
    %203 = vector.load %arg5[%c0_84, %c130_85] : memref<16x386xf32, #tpu.memory_space<vmem>>, vector<16x256xf32>
    %204 = vector.broadcast %29 : vector<1x256xf32> to vector<16x256xf32>
    %205 = arith.mulf %203, %204 : vector<16x256xf32>
    %206 = tpu.concatenate %194, %195, %198, %201, %202, %205 in 0 : vector<16x256xf32>, vector<16x256xf32>, vector<16x256xf32>, vector<16x256xf32>, vector<16x256xf32>, vector<16x256xf32> -> vector<96x256xf32>
    %c3 = arith.constant 3 : index
    %c0_86 = arith.constant 0 : index
    %c0_87 = arith.constant 0 : index
    %207 = vector.load %arg2[%c3, %c0_86, %c0_87] : memref<4x4x96xf32, #tpu.memory_space<vmem>>, vector<1x4x96xf32>
    %208 = vector.shape_cast %207 : vector<1x4x96xf32> to vector<4x96xf32>
    %cst_88 = arith.constant dense<0.000000e+00> : vector<4x256xf32>
    %209 = tpu.matmul %208, %206, %cst_88 {dimension_numbers = #tpu.dot_dimension_numbers<[1], [0], [0], [1], [0, 0, 1, 1], [], []>} : vector<4x96xf32>, vector<96x256xf32>, vector<4x256xf32> -> vector<4x256xf32>
    %c3_89 = arith.constant 3 : index
    %c0_90 = arith.constant 0 : index
    %c0_91 = arith.constant 0 : index
    %210 = vector.load %arg3[%c3_89, %c0_90, %c0_91] : memref<4x16x1xf32, #tpu.memory_space<vmem>>, vector<1x16x1xf32>
    %211 = vector.shape_cast %210 : vector<1x16x1xf32> to vector<16x1xf32>
    %212 = vector.extract_strided_slice %211 {offsets = [0, 0], sizes = [4, 1], strides = [1, 1]} : vector<16x1xf32> to vector<4x1xf32>
    %213 = vector.extract_strided_slice %211 {offsets = [4, 0], sizes = [4, 1], strides = [1, 1]} : vector<16x1xf32> to vector<4x1xf32>
    %214 = vector.extract_strided_slice %211 {offsets = [8, 0], sizes = [4, 1], strides = [1, 1]} : vector<16x1xf32> to vector<4x1xf32>
    %215 = vector.extract_strided_slice %211 {offsets = [12, 0], sizes = [4, 1], strides = [1, 1]} : vector<16x1xf32> to vector<4x1xf32>
    %216 = vector.broadcast %212 : vector<4x1xf32> to vector<4x256xf32>
    %217 = arith.addf %209, %216 : vector<4x256xf32>
    %cst_92 = arith.constant dense<0.000000e+00> : vector<4xf32>
    %218 = vector.multi_reduction <add>, %217, %cst_92 [1] : vector<4x256xf32> to vector<4xf32>
    %219 = vector.shape_cast %218 : vector<4xf32> to vector<4x1xf32>
    %cst_93 = arith.constant 2.560000e+02 : f32
    %220 = vector.broadcast %cst_93 : f32 to vector<4x1xf32>
    %221 = arith.divf %219, %220 : vector<4x1xf32>
    %222 = vector.broadcast %221 : vector<4x1xf32> to vector<4x256xf32>
    %223 = arith.subf %217, %222 : vector<4x256xf32>
    %224 = arith.mulf %223, %223 : vector<4x256xf32>
    %cst_94 = arith.constant dense<0.000000e+00> : vector<4xf32>
    %225 = vector.multi_reduction <add>, %224, %cst_94 [1] : vector<4x256xf32> to vector<4xf32>
    %226 = vector.shape_cast %225 : vector<4xf32> to vector<4x1xf32>
    %cst_95 = arith.constant 2.560000e+02 : f32
    %227 = vector.broadcast %cst_95 : f32 to vector<4x1xf32>
    %228 = arith.divf %226, %227 : vector<4x1xf32>
    %229 = vector.broadcast %221 : vector<4x1xf32> to vector<4x256xf32>
    %230 = arith.subf %217, %229 : vector<4x256xf32>
    %cst_96 = arith.constant 9.99999974E-6 : f32
    %231 = vector.broadcast %cst_96 : f32 to vector<4x1xf32>
    %232 = arith.addf %228, %231 : vector<4x1xf32>
    %233 = math.rsqrt %232 : vector<4x1xf32>
    %234 = vector.broadcast %233 : vector<4x1xf32> to vector<4x256xf32>
    %235 = arith.mulf %230, %234 : vector<4x256xf32>
    %236 = vector.broadcast %213 : vector<4x1xf32> to vector<4x256xf32>
    %237 = arith.mulf %235, %236 : vector<4x256xf32>
    %238 = vector.broadcast %214 : vector<4x1xf32> to vector<4x256xf32>
    %239 = arith.addf %237, %238 : vector<4x256xf32>
    %cst_97 = arith.constant 0.000000e+00 : f32
    %240 = vector.broadcast %cst_97 : f32 to vector<4x256xf32>
    %241 = arith.cmpf oge, %239, %240 : vector<4x256xf32>
    %242 = vector.broadcast %215 : vector<4x1xf32> to vector<4x256xf32>
    %243 = arith.mulf %242, %239 : vector<4x256xf32>
    %244 = arith.select %241, %239, %243 : vector<4x256xi1>, vector<4x256xf32>
    %c0_98 = arith.constant 0 : index
    %c0_99 = arith.constant 0 : index
    %c0_100 = arith.constant 0 : index
    %245 = vector.load %arg4[%c0_98, %c0_99, %c0_100] : memref<1x4x256xf32, #tpu.memory_space<vmem>>, vector<1x4x256xf32>
    %246 = vector.shape_cast %245 : vector<1x4x256xf32> to vector<4x256xf32>
    %247 = vector.shape_cast %244 : vector<4x256xf32> to vector<1x4x256xf32>
    tpu.vector_store %arg4[%c0_98, %c0_99, %c0_100], %247 {strides = array<i32>} : memref<1x4x256xf32, #tpu.memory_space<vmem>>, vector<1x4x256xf32>,
    return
  }
  func.func @transform_0(%arg0: i32) -> (i32, i32, i32) {
    %c0_i32 = arith.constant 0 : i32
    %c0_i32_0 = arith.constant 0 : i32
    %c0_i32_1 = arith.constant 0 : i32
    return %arg0, %c0_i32, %c0_i32_0 : i32, i32, i32
  }
  func.func @transform_1(%arg0: i32) -> (i32, i32, i32) {
    %c0_i32 = arith.constant 0 : i32
    %c0_i32_0 = arith.constant 0 : i32
    %c0_i32_1 = arith.constant 0 : i32
    %c0_i32_2 = arith.constant 0 : i32
    return %c0_i32, %c0_i32_0, %c0_i32_1 : i32, i32, i32
  }
  func.func @transform_2(%arg0: i32) -> (i32, i32, i32) {
    %c0_i32 = arith.constant 0 : i32
    %c0_i32_0 = arith.constant 0 : i32
    %c0_i32_1 = arith.constant 0 : i32
    %c0_i32_2 = arith.constant 0 : i32
    return %c0_i32, %c0_i32_0, %c0_i32_1 : i32, i32, i32
  }
  func.func @transform_3(%arg0: i32) -> (i32, i32, i32) {
    %c0_i32 = arith.constant 0 : i32
    %c0_i32_0 = arith.constant 0 : i32
    %c0_i32_1 = arith.constant 0 : i32
    return %arg0, %c0_i32, %c0_i32_0 : i32, i32, i32
  }
}

</mosaic_0001>

<bundles_post_ra>
// kernel: dense_block_forward.1
= control target key start
LH: loop header
LB: loop body
LE: loop exit
PB: predicated region body
PF: predicated region fallthrough
CT: control target
= control target key end

     0   :  { %s2606_s12 = smov 0   ;;  %s3161_s0 = inlined_call_operand.vmem [shape: f32[2,4,256], index: 0, kind: input, shape index: {}]   ;;  %s3162_s1 = inlined_call_operand.vmem [shape: f32[4,4,96], index: 1, kind: input, shape index: {}]   ;;  %s3163_s2 = inlined_call_operand.vmem [shape: f32[4,16,1], index: 2, kind: input, shape index: {}]   ;;  %s3164_s3 = inlined_call_operand.vmem [shape: f32[2,4,256], index: 3, kind: output, shape index: {}]  }
   0x1 LB: > { %s1825_s13 = sadd.s32 4294967295, %s2564_s12   ;;  %p1829_p0 = scmp.ge.s32.totalorder %s2564_s12, 1  ;;  %s2564_s12 = sphi %s2606_s12, %s13_s12  }
   0x2   : > { %p137_p1 = scmp.lt.s32.totalorder %s2564_s12, 3 }
   0x4   : > { %p138_p2 = pnand %p1829_p0, %p137_p1 }
   0x5   : > { %p161_p3 = scmp.lt.s32.totalorder (!%p138_p2), %s1825_s13, 1  ;;  %v197_v0 = vlaneseq (!%p138_p2)  ;;  %vm174_vm0 = vcmask (!%p138_p2), 15360   ;;  %v2566_v1 = vmov (!%p138_p2), 0.0   ;;  %s2567_s18 = smov (!%p138_p2), 1   ;;  %vm192_vm5 = vcmask (!%p138_p2), 1047564  }
   0x6   : > { %141 = sbr.rel (%p138_p2) target bundleno = 3636 (0xe34), region = 32  ;;  %171 = vst [vmem:[#allocation2] sm:$0xff] (!%p138_p2), %v2566_v1  ;;  %172 = vst [vmem:[#allocation2 + $0x8] sm:$0xff] (!%p138_p2), %v2566_v1  ;;  %601 = vmatprep.mubr.f32.mxu0 (!%p138_p2), %v2566_v1  ;;  %1025 = vmatprep.mubr.f32.mxu1 (!%p138_p2), %v2566_v1  ;;  %s2568_s19 = smov (!%p138_p2), 114   ;;  %vm187_vm6 = vcmask (!%p138_p2), 7168   ;;  %vm195_vm7 = vcmask (!%p138_p2), 7172  }
   0x7   : > { %173 = vst [vmem:[#allocation2 + $0x10] sm:$0xff] (!%p138_p2), %v2566_v1  ;;  %177 = vst [vmem:[#allocation2 + $0x28] sm:$0xff] (!%p138_p2), %v2566_v1  ;;  %v198_v2 = vand.u32 (!%p138_p2), 127, %v197_v0  ;;  %s2569_s20 = smov (!%p138_p2), 2   ;;  %s2570_s21 = smov (!%p138_p2), 112   ;;  %vm265_vm8 = vcmask (!%p138_p2), 932864  }
   0x8   : > { %178 = vst [vmem:[#allocation2 + $0x30] sm:$0xff] (!%p138_p2), %v2566_v1  ;;  %175 = vst.msk [vmem:[#allocation2 + $0x18] sm:$0xff] (!%p138_p2), %vm174_vm0, %v2566_v1  ;;  %s2571_s22 = smov (!%p138_p2), 127   ;;  %s2572_s23 = smov (!%p138_p2), 126   ;;  %vm248_vm9 = vcmask (!%p138_p2), 916480   ;;  %vm314_vm10 = vcmask (!%p138_p2), 1039360  }
   0x9   : > { %179 = vst.msk [vmem:[#allocation2 + $0x38] sm:$0xff] (!%p138_p2), %vm174_vm0, %v2566_v1  ;;  %v199_v3 = vadd.s32 (!%p138_p2), 128, %v198_v2  ;;  %v204_v4 = vand.u32 (!%p138_p2), 15, %v198_v2  ;;  %s2573_s24 = smov (!%p138_p2), 111   ;;  %s2574_s25 = smov (!%p138_p2), 110   ;;  %vm337_vm11 = vcmask (!%p138_p2), 1031168  }
   0xa   : > { %s2575_s26 = smov (!%p138_p2), 16   ;;  %vm370_vm12 = vcmask (!%p138_p2), 908288   ;;  %vm393_vm13 = vcmask (!%p138_p2), 900096   ;;  %vm484_vm14 = vcmask (!%p138_p2), 130048   ;;  %vm533_vm15 = vcmask (!%p138_p2), 785408   ;;  %s2577_s6 = smov (!%p138_p2), 98  }
   0xb   : > { %v211_v6 = vand.u32 (!%p138_p2), 15, %v199_v3  ;;  %vm230_vm1 = vcmp.ne.s32.totalorder (!%p138_p2), %v204_v4, 15  ;;  %vm224_vm2 = vcmp.ne.s32.totalorder (!%p138_p2), %v204_v4, 0  ;;  %s2578_s7 = smov (!%p138_p2), 96   ;;  %s2579_s8 = smov (!%p138_p2), 95  }
   0xc   : > { %v1836_v8 = vsel (!%p138_p2), %vm230_vm1, 1.0, %v2566_v1  ;;  %v2639_v11 = vsel (!%p138_p2), %vm224_vm2, 1.0, %v2566_v1  ;;  %s2580_s9 = smov (!%p138_p2), 94   ;;  %s2581_s10 = smov (!%p138_p2), 32  }
   0xd   : > { %s3166_s13 = smov (!%p161_p3, %s1825_s13), 1  ;;  %vm225_vm3 = vcmp.ne.s32.totalorder %v211_v6, 0  ;;  %vm231_vm4 = vcmp.ne.s32.totalorder %v211_v6, 15  ;;  %v276_v14 = vmul.f32 0.0, %v2639_v11 }
   0xe   : > { %s1853_s14 = sshll.u32 %s3166_s13, 3  ;;  %v1837_v9 = vsel %vm231_vm4, 1.0, %v2566_v1  ;;  %v2642_v12 = vsel %vm225_vm3, 1.0, %v2566_v1  ;;  %vm669_vm3 = vcmask 1043464   ;;  %vm672_vm4 = vcmask 3072  }
   0xf   : > { %s165_s17 = scalar_lea.vmem %s3161_s0, %s1853_s14  ;;  %v2636_v10 = vpack.i.bf16 %v1837_v9, %v1836_v8  ;;  %v2648_v13 = vpack.i.bf16 %v2642_v12, %v2639_v11  ;;  %v277_v15 = vmul.f32 0.0, %v2642_v12  ;;  %v2674_v37 = vld [vmem:[#allocation2 + $0x18] sm:$0xff]  ;;  %s170_s11 = scalar_lea.vmem %s3164_s3, %s1853_s14 }
  0x10   : > { %v180_v5 = vld [vmem:[%s165_s17] sm:$0xff] }
  0x11   : > { %v182_v7 = vcombine.low %v180_v5, %v180_v5  ;;  %1980 = vrot.lane.b32.xlu1 %v2636_v10, %s2568_s19  ;;  %v2659_v16 = vpack.i.bf16 %v277_v15, %v276_v14 }
  0x13   : > { %183 = vrot.lane.b32.xlu0 %v182_v7, %s2567_s18 }
  0x15   : > { %1985 = vrot.lane.b32.xlu1 %v2636_v10, %s2569_s20 }
  0x17   : > { %185 = vrot.lane.b32.xlu0 %v180_v5, %s2567_s18 }
  0x19   : > { %1990 = vrot.lane.b32.xlu1 %v2566_v1, %s2571_s22 }
  0x1b   : > { %2000 = vrot.lane.b32.xlu0 %v2648_v13, %s2570_s21 }
  0x1d   : > { %1995 = vrot.lane.b32.xlu1 %v2566_v1, %s2571_s22 }
  0x21   : > { %2005 = vrot.lane.b32.xlu1 %v2659_v16, %s2570_s21 }
  0x83   : > { %v1981_v18 = vpop.permute.xlu1 %1980 }
  0x84   : > { %v1983_v19 = vunpack.i.h.bf16 %v1981_v18  ;;  %v1982_v20 = vunpack.i.l.bf16 %v1981_v18 }
  0x85   : > { %v184_v17 = vpop.permute.xlu0 %183 }
  0x86   : > { %193 = vst.msk [vmem:[#allocation2 + $0x28] sm:$0xf0] %vm192_vm5, %v184_v17  ;;  %v270_v23 = vmul.f32 0.0, %v1982_v20  ;;  %v266_v24 = vsel %vm265_vm8, %v1982_v20, %v1983_v19  ;;  %v272_v27 = vmul.f32 0.0, %v1983_v19  ;;  %vm698_vm8 = vcmask 801792  }
  0x87   : > { %v271_v26 = vmul.f32 0.0, %v266_v24  ;;  %v1986_v29 = vpop.permute.xlu1 %1985 }
  0x88   : > { %v2009_v25 = vpack.i.bf16 %v270_v23, %v270_v23  ;;  %v2678_v39 = vunpack.i.h.bf16 %v1986_v29  ;;  %v2680_v40 = vunpack.i.l.bf16 %v1986_v29 }
  0x89   : > { %v186_v21 = vpop.permute.xlu0 %185  ;;  %v2014_v30 = vpack.i.bf16 %v272_v27, %v271_v26 }
  0x8a   : > { %v188_v22 = vsel %vm187_vm6, %v184_v17, %v186_v21  ;;  %196 = vst.msk [vmem:[#allocation2 + $0x38] sm:$0xf0] %vm195_vm7, %v186_v21  ;;  %2010 = vrot.lane.b32.xlu0 %v2009_v25, %s2572_s23  ;;  %v2688_v46 = vsel %vm174_vm0, %v2680_v40, %v2678_v39  ;;  %v290_v48 = vmul.f32 0.0, %v2680_v40  ;;  %v2697_v53 = vmul.f32 %v2678_v39, %v2674_v37 }
  0x8b   : > { %194 = vst [vmem:[#allocation2 + $0x30] sm:$0xf0] %v188_v22  ;;  %v2672_v36 = vpop.permute.xlu1 %1990  ;;  %v291_v49 = vmul.f32 0.0, %v2688_v46  ;;  %vm608_vm0 = vcmask 1043456  }
  0x8c   : > { %v1993_v59 = vunpack.i.h.bf16 %v2672_v36  ;;  %v1992_v60 = vunpack.i.l.bf16 %v2672_v36 }
  0x8d   : > { %v2667_v28 = vld [vmem:[#allocation2 + $0x28] sm:$0xff]  ;;  %v2001_v38 = vpop.permute.xlu0 %2000  ;;  %v2703_v56 = vpack.i.bf16 %v291_v49, %v290_v48 }
  0x8e   : > { %2015 = vrot.lane.b32.xlu0 %v2014_v30, %s2572_s23  ;;  %v274_v32 = vmul.f32 %v266_v24, %v2667_v28  ;;  %v2034_v41 = vpack.i.bf16 %v2667_v28, %v2674_v37  ;;  %v2003_v43 = vunpack.i.h.bf16 %v2001_v38  ;;  %v2002_v44 = vunpack.i.l.bf16 %v2001_v38 }
  0x8f   : > { %v278_v47 = vmul.f32 %v2639_v11, %v2667_v28  ;;  %v1996_v50 = vpop.permute.xlu1 %1995  ;;  %v293_v54 = vmul.f32 %v2680_v40, %v2667_v28  ;;  %v316_v6 = vsel %vm314_vm10, %v1992_v60, %v1993_v59 }
  0x90   : > { %v249_v55 = vsel %vm248_vm9, %v2002_v44, %v2003_v43  ;;  %v255_v58 = vmul.f32 0.0, %v2003_v43  ;;  %v253_v3 = vmul.f32 0.0, %v2002_v44  ;;  %v2074_v8 = vpack.i.bf16 %v1993_v59, %v316_v6 }
  0x91   : > { %v281_v45 = vld [vmem:[#allocation2 + $0x38] sm:$0xff]  ;;  %v254_v57 = vmul.f32 0.0, %v249_v55  ;;  %v2054_v61 = vpack.i.bf16 %v293_v54, %v2697_v53  ;;  %v257_v18 = vmul.f32 %v249_v55, %v2667_v28  ;;  %v1997_v24 = vunpack.i.l.bf16 %v1996_v50 }
  0x92   : > { %v241_v31 = vld [vmem:[#allocation2 + $0x30] sm:$0xff]  ;;  %v295_v63 = vmul.f32 %v2678_v39, %v281_v45  ;;  %v2069_v9 = vpack.i.bf16 %v253_v3, %v253_v3  ;;  %v1998_v26 = vunpack.i.h.bf16 %v1996_v50 }
  0x93   : > { %v275_v33 = vmul.f32 %v1983_v19, %v241_v31  ;;  %v2019_v34 = vpack.i.bf16 %v241_v31, %v2667_v28  ;;  %v279_v42 = vmul.f32 %v2642_v12, %v241_v31  ;;  %v2039_v52 = vpack.i.bf16 %v281_v45, %v241_v31  ;;  %v2710_v0 = vpop.permute.xlu1 %2005 }
  0x94   : > { %v294_v62 = vmul.f32 %v2688_v46, %v241_v31  ;;  %v2064_v2 = vpack.i.bf16 %v255_v58, %v254_v57  ;;  %v2008_v4 = vunpack.i.h.bf16 %v2710_v0  ;;  %v2007_v5 = vunpack.i.l.bf16 %v2710_v0 }
  0x95   : > { %v2024_v35 = vpack.i.bf16 %v275_v33, %v274_v32  ;;  %2020 = vrot.lane.b32.xlu0 %v2019_v34, %s2571_s22  ;;  %v2044_v51 = vpack.i.bf16 %v279_v42, %v278_v47  ;;  %v258_v17 = vmul.f32 %v2003_v43, %v241_v31  ;;  %v315_v28 = vsel %vm314_vm10, %v1997_v24, %v1992_v60 }
  0x96   : > { %v2059_v7 = vpack.i.bf16 %v295_v63, %v294_v62  ;;  %v354_v14 = vsel %vm248_vm9, %v2007_v5, %v2008_v4 }
  0x97   : > { %2025 = vrot.lane.b32.xlu1 %v2024_v35, %s2572_s23  ;;  %v2079_v15 = vpack.i.bf16 %v2008_v4, %v354_v14  ;;  %v2084_v19 = vpack.i.bf16 %v258_v17, %v257_v18 }
  0x99   : > { %2035 = vrot.lane.b32.xlu0 %v2034_v41, %s2573_s24 }
  0x9b   : > { %2030 = vrot.lane.b32.xlu1 %v2566_v1, %s2573_s24 }
  0x9d   : > { %2045 = vrot.lane.b32.xlu0 %v2044_v51, %s2570_s21  ;;  %s2582_s21 = smov 64  }
  0x9f   : > { %2040 = vrot.lane.b32.xlu1 %v2039_v52, %s2573_s24  ;;  %s2583_s24 = smov 66  }
  0xa1   : > { %2050 = vrot.lane.b32.xlu0 %v2703_v56, %s2574_s25 }
  0xa3   : > { %2055 = vrot.lane.b32.xlu1 %v2054_v61, %s2574_s25 }
  0xa5   : > { %2060 = vrot.lane.b32.xlu0 %v2059_v7, %s2574_s25  ;;  %s2584_s25 = smov 63  }
  0xa7   : > { %2065 = vrot.lane.b32.xlu1 %v2064_v2, %s2575_s26 }
  0xa9   : > { %2075 = vrot.lane.b32.xlu0 %v2074_v8, %s2575_s26 }
  0xab   : > { %2070 = vrot.lane.b32.xlu1 %v2069_v9, %s2575_s26 }
  0xad   : > { %2080 = vrot.lane.b32.xlu0 %v2079_v15, %s2575_s26 }
  0xb1   : > { %2085 = vrot.lane.b32.xlu0 %v2084_v19, %s2575_s26 }
  0xfc   : > { %v2011_v20 = vpop.permute.xlu0 %2010 }
  0xfd   : > { %v2013_v35 = vunpack.i.h.bf16 %v2011_v20  ;;  %v2012_v41 = vunpack.i.l.bf16 %v2011_v20 }
 0x100   : > { %v2016_v21 = vpop.permute.xlu0 %2015 }
 0x101   : > { %v2018_v22 = vunpack.i.h.bf16 %v2016_v21  ;;  %v2017_v23 = vunpack.i.l.bf16 %v2016_v21 }
 0x103   : > { %v339_v25 = vsel %vm337_vm11, %v2017_v23, %v2018_v22  ;;  %v338_v52 = vsel %vm337_vm11, %v2012_v41, %v2017_v23 }
 0x104   : > { %v2089_v30 = vpack.i.bf16 %v2018_v22, %v339_v25 }
 0x106   : > { %2090 = vrot.lane.b32.xlu1 %v2089_v30, %s2575_s26 }
 0x107   : > { %v2021_v29 = vpop.permute.xlu0 %2020 }
 0x108   : > { %v2023_v33 = vunpack.i.h.bf16 %v2021_v29  ;;  %v2022_v34 = vunpack.i.l.bf16 %v2021_v29 }
 0x109   : > { %v2026_v27 = vpop.permute.xlu1 %2025 }
 0x10a   : > { %v2028_v31 = vunpack.i.h.bf16 %v2026_v27  ;;  %v2027_v32 = vunpack.i.l.bf16 %v2026_v27  ;;  %v317_v36 = vsel %vm314_vm10, %v1998_v26, %v2022_v34  ;;  %v318_v38 = vsel %vm314_vm10, %v2022_v34, %v2023_v33 }
 0x10b   : > { %v2036_v43 = vpop.permute.xlu0 %2035  ;;  %v2094_v44 = vpack.i.bf16 %v317_v36, %v315_v28  ;;  %v2099_v45 = vpack.i.bf16 %v2023_v33, %v318_v38  ;;  %v2576_v34 = vmov 0  }
 0x10c   : > { %v341_v47 = vsel %vm337_vm11, %v2027_v32, %v2028_v31  ;;  %v2037_v50 = vunpack.i.l.bf16 %v2036_v43  ;;  %v340_v51 = vsel %vm337_vm11, %v2013_v35, %v2027_v32  ;;  %v2038_v3 = vunpack.i.h.bf16 %v2036_v43  ;;  %2154 = vset.pattern.permute.xlu1 %v2576_v34  ;;  %2155 = vset.pattern.permute.xlu0 %v2576_v34 }
 0x10d   : > { %v2031_v42 = vpop.permute.xlu1 %2030  ;;  %2095 = vrot.lane.b32.xlu0 %v2094_v44, %s2575_s26  ;;  %2100 = vrot.lane.b32.xlu1 %v2099_v45, %s2575_s26  ;;  %v2109_v57 = vpack.i.bf16 %v2028_v31, %v341_v47  ;;  %v2104_v58 = vpack.i.bf16 %v340_v51, %v338_v52  ;;  %v399_v44 = vld [vmem:[%s3163_s2] sm:$0xff] }
 0x10e   : > { %v2033_v48 = vunpack.i.h.bf16 %v2031_v42  ;;  %v2032_v49 = vunpack.i.l.bf16 %v2031_v42 }
 0x10f   : > { %v2046_v55 = vpop.permute.xlu0 %2045 }
 0x110   : > { %v371_v59 = vsel %vm370_vm12, %v2032_v49, %v2033_v48  ;;  %v372_v60 = vsel %vm370_vm12, %v2033_v48, %v2037_v50  ;;  %v2048_v63 = vunpack.i.h.bf16 %v2046_v55  ;;  %v2047_v2 = vunpack.i.l.bf16 %v2046_v55 }
 0x111   : > { %v2041_v54 = vpop.permute.xlu1 %2040  ;;  %2110 = vrot.lane.b32.xlu0 %v2109_v57, %s2575_s26  ;;  %2105 = vrot.lane.b32.xlu1 %v2104_v58, %s2575_s26  ;;  %v2119_v8 = vpack.i.bf16 %v372_v60, %v371_v59  ;;  %v2134_v30 = vpack.i.bf16 %v2038_v3, %v2032_v49 }
 0x112   : > { %v2043_v61 = vunpack.i.h.bf16 %v2041_v54  ;;  %v2042_v62 = vunpack.i.l.bf16 %v2041_v54  ;;  %v2114_v4 = vpack.i.bf16 %v2047_v2, %v2007_v5  ;;  %v355_v19 = vsel %vm248_vm9, %v2047_v2, %v2048_v63 }
 0x113   : > { %v2051_v7 = vpop.permute.xlu0 %2050  ;;  %v2129_v5 = vpack.i.bf16 %v2048_v63, %v355_v19  ;;  %vm793_vm9 = vcmask 777216  }
 0x114   : > { %v373_v9 = vsel %vm370_vm12, %v2038_v3, %v2042_v62  ;;  %v374_v14 = vsel %vm370_vm12, %v2042_v62, %v2043_v61  ;;  %v2053_v17 = vunpack.i.h.bf16 %v2051_v7  ;;  %v2052_v18 = vunpack.i.l.bf16 %v2051_v7 }
 0x115   : > { %v2056_v6 = vpop.permute.xlu1 %2055  ;;  %2115 = vrot.lane.b32.xlu0 %v2114_v4, %s2575_s26  ;;  %2120 = vrot.lane.b32.xlu1 %v2119_v8, %s2575_s26  ;;  %v2124_v0 = vpack.i.bf16 %v374_v14, %v373_v9  ;;  %vm816_vm12 = vcmask 769024  }
 0x116   : > { %v2057_v15 = vunpack.i.l.bf16 %v2056_v6  ;;  %v394_v24 = vsel %vm393_vm13, %v2052_v18, %v2053_v17  ;;  %v2058_v26 = vunpack.i.h.bf16 %v2056_v6 }
 0x117   : > { %v2061_v20 = vpop.permute.xlu0 %2060 }
 0x118   : > { %v2063_v22 = vunpack.i.h.bf16 %v2061_v20  ;;  %v2062_v23 = vunpack.i.l.bf16 %v2061_v20  ;;  %v395_v25 = vsel %vm393_vm13, %v2053_v17, %v2057_v15  ;;  %v2149_v35 = vpack.i.bf16 %v2058_v26, %v2052_v18 }
 0x119   : > { %v2066_v21 = vpop.permute.xlu1 %2065  ;;  %2125 = vrot.lane.b32.xlu0 %v2124_v0, %s2575_s26  ;;  %2130 = vrot.lane.b32.xlu1 %v2129_v5, %s2575_s26  ;;  %v2139_v29 = vpack.i.bf16 %v395_v25, %v394_v24 }
 0x11a   : > { %v396_v31 = vsel %vm393_vm13, %v2058_v26, %v2062_v23  ;;  %v397_v32 = vsel %vm393_vm13, %v2062_v23, %v2063_v22  ;;  %v2068_v38 = vunpack.i.h.bf16 %v2066_v21  ;;  %v2067_v41 = vunpack.i.l.bf16 %v2066_v21 }
 0x11b   : > { %v2076_v27 = vpop.permute.xlu0 %2075  ;;  %v2144_v36 = vpack.i.bf16 %v397_v32, %v396_v31  ;;  %vm909_vm13 = vcmask 261120  }
 0x11c   : > { %v486_v49 = vsel %vm484_vm14, %v2067_v41, %v2068_v38  ;;  %v2078_v58 = vunpack.i.h.bf16 %v2076_v27  ;;  %v2077_v59 = vunpack.i.l.bf16 %v2076_v27 }
 0x11d   : > { %2140 = vrot.lane.b32.xlu0 %v2139_v29, %s2575_s26  ;;  %2135 = vrot.lane.b32.xlu1 %v2134_v30, %s2575_s26  ;;  %v2071_v33 = vpop.permute.xlu1 %2070 }
 0x11e   : > { %v2072_v42 = vunpack.i.l.bf16 %v2071_v33  ;;  %v2073_v43 = vunpack.i.h.bf16 %v2071_v33  ;;  %v490_v6 = vsel %vm484_vm14, %v2077_v59, %v2078_v58 }
 0x11f   : > { %v2754_v28 = vpop.permute.xlu0 %2080 }
 0x120   : > { %v485_v50 = vsel %vm484_vm14, %v2072_v42, %v2067_v41  ;;  %v2083_v31 = vunpack.i.h.bf16 %v2754_v28  ;;  %v2082_v32 = vunpack.i.l.bf16 %v2754_v28 }
 0x121   : > { %2150 = vrot.lane.b32.xlu0 %v2149_v35, %s2575_s26  ;;  %2145 = vrot.lane.b32.xlu1 %v2144_v36, %s2575_s26  ;;  %s2585_s26 = smov 62  }
 0x123   : > { %v2086_v45 = vpop.permute.xlu0 %2085 }
 0x124   : > { %v2088_v47 = vunpack.i.h.bf16 %v2086_v45  ;;  %v2087_v48 = vunpack.i.l.bf16 %v2086_v45 }
 0x125   : > { %403 = vperm.xlu1 %2154, %v399_v44  }
 0x126   : > { %v488_v51 = vsel %vm484_vm14, %v2087_v48, %v2088_v47  ;;  %v487_v52 = vsel %vm484_vm14, %v2073_v43, %v2087_v48  ;;  %v498_v47 = vsel %vm484_vm14, %v2082_v32, %v2083_v31 }
 0x127   : > { %v1855_v54 = vpack.c.bf16 %v488_v51, %v486_v49  ;;  %v1857_v55 = vpack.c.bf16 %v487_v52, %v485_v50 }
 0x129   : > { %1856 = vmatprep.subr.bf16.mxu0 %v1855_v54 }
 0x12a   : > { %1858 = vmatpush1.bf16.msra.mxu0 %v1857_v55 }
 0x178   : > { %v2091_v57 = vpop.permute.xlu1 %2090 }
 0x179   : > { %v2093_v4 = vunpack.i.h.bf16 %v2091_v57  ;;  %v2092_v7 = vunpack.i.l.bf16 %v2091_v57 }
 0x17b   : > { %v494_v22 = vsel %vm484_vm14, %v2092_v7, %v2093_v4 }
 0x17f   : > { %v2096_v60 = vpop.permute.xlu0 %2095  ;;  %v2101_v61 = vpop.permute.xlu1 %2100 }
 0x180   : > { %v2098_v62 = vunpack.i.h.bf16 %v2096_v60  ;;  %v2097_v63 = vunpack.i.l.bf16 %v2096_v60  ;;  %v2103_v2 = vunpack.i.h.bf16 %v2101_v61  ;;  %v2102_v3 = vunpack.i.l.bf16 %v2101_v61 }
 0x182   : > { %v492_v8 = vsel %vm484_vm14, %v2102_v3, %v2103_v2  ;;  %v489_v9 = vsel %vm484_vm14, %v2097_v63, %v2077_v59  ;;  %v491_v14 = vsel %vm484_vm14, %v2098_v62, %v2102_v3 }
 0x183   : > { %v2111_v15 = vpop.permute.xlu0 %2110  ;;  %v2106_v17 = vpop.permute.xlu1 %2105  ;;  %v1859_v18 = vpack.c.bf16 %v492_v8, %v490_v6  ;;  %v1861_v19 = vpack.c.bf16 %v491_v14, %v489_v9 }
 0x184   : > { %v2113_v20 = vunpack.i.h.bf16 %v2111_v15  ;;  %v2112_v0 = vunpack.i.l.bf16 %v2111_v15  ;;  %v2108_v5 = vunpack.i.h.bf16 %v2106_v17  ;;  %v2107_v21 = vunpack.i.l.bf16 %v2106_v17 }
 0x185   : > { %1860 = vmatprep.subr.bf16.mxu0 %v1859_v18 }
 0x186   : > { %1862 = vmatpush1.bf16.msra.mxu0 %v1861_v19  ;;  %v496_v23 = vsel %vm484_vm14, %v2112_v0, %v2113_v20  ;;  %v493_v24 = vsel %vm484_vm14, %v2107_v21, %v2092_v7  ;;  %v495_v25 = vsel %vm484_vm14, %v2108_v5, %v2112_v0  ;;  %v398_v5 = vld [vmem:[%s3162_s1] sm:$0xf] }
 0x187   : > { %v2116_v26 = vpop.permute.xlu0 %2115  ;;  %v2121_v27 = vpop.permute.xlu1 %2120  ;;  %v1863_v29 = vpack.c.bf16 %v496_v23, %v494_v22  ;;  %v1865_v30 = vpack.c.bf16 %v495_v25, %v493_v24 }
 0x188   : > { %v2117_v33 = vunpack.i.l.bf16 %v2116_v26  ;;  %v2118_v34 = vunpack.i.h.bf16 %v2116_v26  ;;  %v2123_v35 = vunpack.i.h.bf16 %v2121_v27  ;;  %v2122_v36 = vunpack.i.l.bf16 %v2121_v27 }
 0x189   : > { %1864 = vmatprep.subr.bf16.mxu0 %v1863_v29 }
 0x18a   : > { %1866 = vmatpush1.bf16.msra.mxu0 %v1865_v30  ;;  %v497_v49 = vsel %vm484_vm14, %v2117_v33, %v2082_v32  ;;  %v502_v59 = vsel %vm484_vm14, %v2122_v36, %v2123_v35  ;;  %v400_v30 = vld [vmem:[%s3163_s2 + $0x8] sm:$0xff] }
 0x18b   : > { %v2126_v38 = vpop.permute.xlu0 %2125  ;;  %v2131_v41 = vpop.permute.xlu1 %2130 }
 0x18c   : > { %v2128_v42 = vunpack.i.h.bf16 %v2126_v38  ;;  %v2127_v43 = vunpack.i.l.bf16 %v2126_v38  ;;  %v2133_v44 = vunpack.i.h.bf16 %v2131_v41  ;;  %v2132_v45 = vunpack.i.l.bf16 %v2131_v41 }
 0x18e   : > { %v500_v48 = vsel %vm484_vm14, %v2132_v45, %v2133_v44  ;;  %v499_v28 = vsel %vm484_vm14, %v2118_v34, %v2132_v45  ;;  %v504_v50 = vsel %vm484_vm14, %v2127_v43, %v2128_v42 }
 0x18f   : > { %v2141_v51 = vpop.permute.xlu0 %2140  ;;  %v2136_v52 = vpop.permute.xlu1 %2135  ;;  %v1867_v54 = vpack.c.bf16 %v500_v48, %v498_v47  ;;  %v1869_v55 = vpack.c.bf16 %v499_v28, %v497_v49  ;;  %v1871_v60 = vpack.c.bf16 %v504_v50, %v502_v59 }
 0x190   : > { %v2138_v57 = vunpack.i.h.bf16 %v2136_v52  ;;  %v2137_v58 = vunpack.i.l.bf16 %v2136_v52  ;;  %v2143_v61 = vunpack.i.h.bf16 %v2141_v51  ;;  %v2142_v62 = vunpack.i.l.bf16 %v2141_v51 }
 0x191   : > { %1868 = vmatprep.subr.bf16.mxu0 %v1867_v54 }
 0x192   : > { %1870 = vmatpush1.bf16.msra.mxu0 %v1869_v55  ;;  %v501_v63 = vsel %vm484_vm14, %v2137_v58, %v2122_v36  ;;  %v503_v2 = vsel %vm484_vm14, %v2138_v57, %v2127_v43  ;;  %v506_v15 = vsel %vm484_vm14, %v2142_v62, %v2143_v61 }
 0x193   : > { %v2151_v3 = vpop.permute.xlu0 %2150  ;;  %v2146_v4 = vpop.permute.xlu1 %2145  ;;  %1872 = vmatprep.subr.bf16.mxu0 %v1871_v60  ;;  %v1873_v6 = vpack.c.bf16 %v503_v2, %v501_v63 }
 0x194   : > { %v2153_v7 = vunpack.i.h.bf16 %v2151_v3  ;;  %v2152_v8 = vunpack.i.l.bf16 %v2151_v3  ;;  %v2148_v9 = vunpack.i.h.bf16 %v2146_v4  ;;  %v2147_v14 = vunpack.i.l.bf16 %v2146_v4 }
 0x196   : > { %1874 = vmatpush1.bf16.msra.mxu0 %v1873_v6  ;;  %v508_v17 = vsel %vm484_vm14, %v2147_v14, %v2148_v9  ;;  %v505_v18 = vsel %vm484_vm14, %v2152_v8, %v2142_v62  ;;  %v507_v19 = vsel %vm484_vm14, %v2153_v7, %v2147_v14 }
 0x197   : > { %v1875_v20 = vpack.c.bf16 %v508_v17, %v506_v15  ;;  %v1877_v0 = vpack.c.bf16 %v507_v19, %v505_v18 }
 0x199   : > { %1876 = vmatprep.subr.bf16.mxu0 %v1875_v20 }
 0x19a   : > { %1878 = vmatpush1.bf16.msra.mxu0 %v1877_v0 }
 0x19d   : > { %1838 = vmatmul.mubr.msk.f32.vlgmr.msra.gmra.mrb[0].mxu0 %vm533_vm15, %v398_v5 }
 0x19e   : > { %1447 = vmatprep.mubr.f32.mxu0 %v2566_v1 }
 0x1a4   : > { %v404_v21 = vpop.permute.xlu1 %403 }
 0x1a5   : > { %v630_v48 = vrot.slane %v404_v21, 4 }
 0x270   : > { %v603_v22 = vpop.f32.mrb[0].mxu0 }
 0x271   : > { %v604_v23 = vadd.f32 %v603_v22, %v404_v21  ;;  %v605_v24 = vpop.f32.mrb[1].mxu0 }
 0x272   : > { %v606_v25 = vadd.f32 %v605_v24, %v404_v21 }
 0x273   : > { %v609_v26 = vsel %vm608_vm0, %v604_v23, 0.0 }
 0x274   : > { %v610_v27 = vsel %vm608_vm0, %v606_v25, 0.0 }
 0x275   : > { %v611_v29 = vadd.f32 %v610_v27, %v609_v26 }
 0x277   : > { %612 = vadd.xlane.f32.xlu0 %v611_v29 }
 0x28d   : > { %636 = vperm.xlu0 %2155, %v400_v30  }
 0x304   : > { %v613_v31 = vpop.xlane.xlu0 %612 }
 0x305   : > { %v615_v32 = vmul.f32 0.00390625, %v613_v31 }
 0x307   : > { %v616_v33 = vsub.f32 %v604_v23, %v615_v32  ;;  %v617_v34 = vsub.f32 %v606_v25, %v615_v32 }
 0x309   : > { %v618_v35 = vmul.f32 %v616_v33, %v616_v33  ;;  %v619_v36 = vmul.f32 %v617_v34, %v617_v34 }
 0x30b   : > { %v620_v38 = vsel %vm608_vm0, %v618_v35, 0.0  ;;  %v621_v41 = vsel %vm608_vm0, %v619_v36, 0.0 }
 0x30c   : > { %v622_v42 = vadd.f32 %v621_v41, %v620_v38  ;;  %v637_v50 = vpop.permute.xlu0 %636 }
 0x30e   : > { %623 = vadd.xlane.f32.xlu1 %v622_v42 }
 0x39b   : > { %v624_v43 = vpop.xlane.xlu1 %623 }
 0x39c   : > { %v625_v44 = vmul.f32 0.00390625, %v624_v43 }
 0x39e   : > { %v626_v45 = vadd.f32 1e-05, %v625_v44 }
 0x3a0   : > { %2547 = vrsqrt.f32 %v626_v45 }
 0x3aa   : > { %v2548_v47 = vpop.eup %2547 }
 0x3ab   : > { %v628_v49 = vmul.f32 %v2548_v47, %v616_v33  ;;  %v629_v28 = vmul.f32 %v2548_v47, %v617_v34 }
 0x3ad   : > { %v632_v51 = vmul.f32 %v630_v48, %v628_v49  ;;  %v633_v52 = vmul.f32 %v630_v48, %v629_v28 }
 0x3af   : > { %v639_v54 = vadd.f32 %v637_v50, %v632_v51  ;;  %v640_v55 = vadd.f32 %v637_v50, %v633_v52 }
 0x3b1   : > { %v645_v57 = vrot.slane %v639_v54, 4  ;;  %v646_v58 = vrot.slane %v640_v55, 4  ;;  %vm641_vm1 = vcmp.ge.f32.partialorder %v639_v54, 0.0  ;;  %vm642_vm2 = vcmp.ge.f32.partialorder %v640_v55, 0.0 }
 0x3b3   : > { %v649_v59 = vmul.f32 %v645_v57, %v637_v50  ;;  %v650_v60 = vmul.f32 %v646_v58, %v637_v50 }
 0x3b5   : > { %v653_v61 = vrot.slane %v649_v59, 4  ;;  %v654_v63 = vrot.slane %v650_v60, 4 }
 0x3b7   : > { %v657_v62 = vsel %vm641_vm1, %v639_v54, %v653_v61  ;;  %v658_v2 = vsel %vm642_vm2, %v640_v55, %v654_v63  ;;  %vm1106_vm2 = vcmask 523264  }
 0x3b8   : > { %661 = vrot.lane.b32.xlu1 %v657_v62, %s2567_s18 }
 0x3bc   : > { %663 = vrot.lane.b32.xlu1 %v658_v2, %s2567_s18 }
 0x3c0   : > { %2157 = vrot.lane.b32.xlu1 %v2636_v10, %s2577_s6 }
 0x3c4   : > { %2162 = vrot.lane.b32.xlu1 %v2648_v13, %s2578_s7 }
 0x3c8   : > { %2167 = vrot.lane.b32.xlu1 %v2566_v1, %s2571_s22 }
 0x3cc   : > { %2172 = vrot.lane.b32.xlu1 %v2566_v1, %s2571_s22 }
 0x3d0   : > { %2187 = vrot.lane.b32.xlu1 %v2659_v16, %s2578_s7 }
 0x42a   : > { %v662_v3 = vpop.permute.xlu1 %661 }
 0x42b   : > { %670 = vst.msk [vmem:[#allocation2 + $0x28] sm:$0xf] %vm669_vm3, %v662_v3 }
 0x42e   : > { %v664_v4 = vpop.permute.xlu1 %663 }
 0x42f   : > { %v665_v6 = vsel %vm187_vm6, %v662_v3, %v664_v4  ;;  %673 = vst.msk [vmem:[#allocation2 + $0x38] sm:$0xf] %vm672_vm4, %v664_v4 }
 0x430   : > { %671 = vst [vmem:[#allocation2 + $0x30] sm:$0xf] %v665_v6 }
 0x432   : > { %v2158_v7 = vpop.permute.xlu1 %2157  ;;  %v2813_v16 = vld [vmem:[#allocation2 + $0x28] sm:$0xff] }
 0x433   : > { %v2160_v8 = vunpack.i.h.bf16 %v2158_v7  ;;  %v2159_v9 = vunpack.i.l.bf16 %v2158_v7  ;;  %v1519_v24 = vld [vmem:[#allocation2 + $0x28] sm:$0xff]  ;;  %v2206_v35 = vpack.i.bf16 %v2813_v16, %v2674_v37  ;;  %v711_v44 = vmul.f32 %v2639_v11, %v2813_v16 }
 0x434   : > { %v2827_v29 = vmul.f32 %v1519_v24, %v2688_v46  ;;  %v2851_v37 = vmul.f32 %v2680_v40, %v2813_v16 }
 0x435   : > { %v699_v14 = vsel %vm698_vm8, %v2159_v9, %v2160_v8  ;;  %v705_v15 = vmul.f32 0.0, %v2160_v8  ;;  %v703_v21 = vmul.f32 0.0, %v2159_v9  ;;  %vm1121_vm8 = vcmask 539648  }
 0x436   : > { %v2163_v17 = vpop.permute.xlu1 %2162  ;;  %v704_v18 = vmul.f32 0.0, %v699_v14  ;;  %v707_v22 = vmul.f32 %v699_v14, %v2813_v16  ;;  %v714_v42 = vld [vmem:[#allocation2 + $0x38] sm:$0xff]  ;;  %v2226_v50 = vpack.i.bf16 %v2851_v37, %v2697_v53 }
 0x437   : > { %v2815_v19 = vld [vmem:[#allocation2 + $0x30] sm:$0xff]  ;;  %v2181_v27 = vpack.i.bf16 %v703_v21, %v703_v21  ;;  %v2165_v38 = vunpack.i.h.bf16 %v2163_v17  ;;  %v2164_v41 = vunpack.i.l.bf16 %v2163_v17  ;;  %v720_v52 = vmul.f32 %v2678_v39, %v714_v42 }
 0x438   : > { %v2819_v20 = vpack.i.bf16 %v2815_v19, %v2813_v16  ;;  %v2176_v0 = vpack.i.bf16 %v705_v15, %v704_v18  ;;  %v708_v5 = vmul.f32 %v2160_v8, %v2815_v19  ;;  %v1525_v25 = vld [vmem:[#allocation2 + $0x30] sm:$0xff]  ;;  %v712_v36 = vmul.f32 %v2642_v12, %v2815_v19 }
 0x439   : > { %v2830_v30 = vmul.f32 %v2678_v39, %v1525_v25  ;;  %v2845_v45 = vpack.i.bf16 %v714_v42, %v2815_v19  ;;  %v684_v48 = vsel %vm533_vm15, %v2164_v41, %v2165_v38  ;;  %v690_v49 = vmul.f32 0.0, %v2165_v38 }
 0x43a   : > { %2192 = vrot.lane.b32.xlu1 %v2819_v20, %s2571_s22  ;;  %2177 = vrot.lane.b32.xlu0 %v2176_v0, %s2572_s23  ;;  %v2168_v23 = vpop.permute.xlu1 %2167  ;;  %v2196_v26 = vpack.i.bf16 %v708_v5, %v707_v22  ;;  %v2847_v47 = vpack.i.bf16 %v712_v36, %v711_v44  ;;  %v719_v51 = vmul.f32 %v2815_v19, %v2688_v46  ;;  %v688_v57 = vmul.f32 0.0, %v2164_v41 }
 0x43b   : > { %v2169_v32 = vunpack.i.l.bf16 %v2168_v23  ;;  %v2511_v34 = vpack.i.bf16 %v2830_v30, %v2827_v29  ;;  %v2170_v28 = vunpack.i.h.bf16 %v2168_v23  ;;  %v692_v2 = vmul.f32 %v684_v48, %v2813_v16 }
 0x43c   : > { %v2868_v53 = vpack.i.bf16 %v720_v52, %v719_v51  ;;  %v2241_v62 = vpack.i.bf16 %v688_v57, %v688_v57  ;;  %v693_v3 = vmul.f32 %v2165_v38, %v2815_v19 }
 0x43d   : > { %v740_v58 = vsel %vm314_vm10, %v2169_v32, %v2170_v28 }
 0x43e   : > { %2197 = vrot.lane.b32.xlu1 %v2196_v26, %s2572_s23  ;;  %2182 = vrot.lane.b32.xlu0 %v2181_v27, %s2572_s23  ;;  %v2173_v31 = vpop.permute.xlu1 %2172  ;;  %v2246_v61 = vpack.i.bf16 %v2170_v28, %v740_v58  ;;  %v2261_v4 = vpack.i.bf16 %v693_v3, %v692_v2 }
 0x43f   : > { %v2174_v33 = vunpack.i.l.bf16 %v2173_v31  ;;  %v2175_v6 = vunpack.i.h.bf16 %v2173_v31 }
 0x441   : > { %v739_v43 = vsel %vm314_vm10, %v2174_v33, %v2169_v32 }
 0x442   : > { %2202 = vrot.lane.b32.xlu1 %v2566_v1, %s2579_s8  ;;  %2207 = vrot.lane.b32.xlu0 %v2206_v35, %s2579_s8  ;;  %v689_v1 = vmul.f32 0.0, %v684_v48  ;;  %v2862_v54 = vpop.permute.xlu1 %2187 }
 0x443   : > { %v2190_v59 = vunpack.i.h.bf16 %v2862_v54  ;;  %v2189_v60 = vunpack.i.l.bf16 %v2862_v54 }
 0x444   : > { %v2236_v55 = vpack.i.bf16 %v690_v49, %v689_v1 }
 0x445   : > { %v777_v63 = vsel %vm533_vm15, %v2189_v60, %v2190_v59 }
 0x446   : > { %2212 = vrot.lane.b32.xlu1 %v2845_v45, %s2579_s8  ;;  %2217 = vrot.lane.b32.xlu0 %v2847_v47, %s2578_s7 }
 0x44a   : > { %2227 = vrot.lane.b32.xlu1 %v2226_v50, %s2580_s9  ;;  %2222 = vrot.lane.b32.xlu0 %v2703_v56, %s2580_s9  ;;  %v2256_v56 = vpack.i.bf16 %v2190_v59, %v777_v63 }
 0x44e   : > { %2232 = vrot.lane.b32.xlu0 %v2868_v53, %s2580_s9  ;;  %2237 = vrot.lane.b32.xlu1 %v2236_v55, %s2581_s10 }
 0x452   : > { %2247 = vrot.lane.b32.xlu0 %v2246_v61, %s2581_s10  ;;  %2242 = vrot.lane.b32.xlu1 %v2241_v62, %s2581_s10 }
 0x456   : > { %2257 = vrot.lane.b32.xlu0 %v2256_v56, %s2581_s10 }
 0x45a   : > { %2262 = vrot.lane.b32.xlu0 %v2261_v4, %s2581_s10 }
 0x4ac   : > { %v2193_v7 = vpop.permute.xlu1 %2192  ;;  %v2178_v8 = vpop.permute.xlu0 %2177 }
 0x4ad   : > { %v2195_v9 = vunpack.i.h.bf16 %v2193_v7  ;;  %v2194_v14 = vunpack.i.l.bf16 %v2193_v7  ;;  %v2180_v15 = vunpack.i.h.bf16 %v2178_v8  ;;  %v2179_v17 = vunpack.i.l.bf16 %v2178_v8 }
 0x4af   : > { %v762_v18 = vsel %vm337_vm11, %v2179_v17, %v2180_v15  ;;  %v741_v0 = vsel %vm314_vm10, %v2175_v6, %v2194_v14  ;;  %v742_v5 = vsel %vm314_vm10, %v2194_v14, %v2195_v9 }
 0x4b0   : > { %v2251_v21 = vpack.i.bf16 %v2180_v15, %v762_v18  ;;  %v2198_v22 = vpop.permute.xlu1 %2197  ;;  %v2183_v23 = vpop.permute.xlu0 %2182  ;;  %v2266_v24 = vpack.i.bf16 %v741_v0, %v739_v43  ;;  %v2271_v33 = vpack.i.bf16 %v2195_v9, %v742_v5 }
 0x4b1   : > { %v2200_v25 = vunpack.i.h.bf16 %v2198_v22  ;;  %v2199_v26 = vunpack.i.l.bf16 %v2198_v22  ;;  %v2185_v27 = vunpack.i.h.bf16 %v2183_v23  ;;  %v2184_v31 = vunpack.i.l.bf16 %v2183_v23 }
 0x4b2   : > { %2267 = vrot.lane.b32.xlu0 %v2266_v24, %s2581_s10  ;;  %2252 = vrot.lane.b32.xlu1 %v2251_v21, %s2581_s10 }
 0x4b3   : > { %v764_v32 = vsel %vm337_vm11, %v2199_v26, %v2200_v25  ;;  %v761_v41 = vsel %vm337_vm11, %v2184_v31, %v2179_v17  ;;  %v763_v48 = vsel %vm337_vm11, %v2185_v27, %v2199_v26 }
 0x4b4   : > { %v2281_v35 = vpack.i.bf16 %v2200_v25, %v764_v32  ;;  %v2203_v36 = vpop.permute.xlu1 %2202  ;;  %v2208_v38 = vpop.permute.xlu0 %2207  ;;  %v2276_v28 = vpack.i.bf16 %v763_v48, %v761_v41  ;;  %v1840_v41 = vld [vmem:[%s3163_s2 + $0x10] sm:$0xff] }
 0x4b5   : > { %v2205_v42 = vunpack.i.h.bf16 %v2203_v36  ;;  %v2204_v44 = vunpack.i.l.bf16 %v2203_v36  ;;  %v2209_v43 = vunpack.i.l.bf16 %v2208_v38  ;;  %v2210_v58 = vunpack.i.h.bf16 %v2208_v38 }
 0x4b6   : > { %2282 = vrot.lane.b32.xlu0 %v2281_v35, %s2581_s10  ;;  %2272 = vrot.lane.b32.xlu1 %v2271_v33, %s2581_s10 }
 0x4b7   : > { %v794_v50 = vsel %vm793_vm9, %v2204_v44, %v2205_v42  ;;  %v795_v51 = vsel %vm793_vm9, %v2205_v42, %v2209_v43  ;;  %v2306_v22 = vpack.i.bf16 %v2210_v58, %v2204_v44 }
 0x4b8   : > { %v2213_v1 = vpop.permute.xlu1 %2212  ;;  %v2218_v49 = vpop.permute.xlu0 %2217  ;;  %v2291_v63 = vpack.i.bf16 %v795_v51, %v794_v50 }
 0x4b9   : > { %v2215_v52 = vunpack.i.h.bf16 %v2213_v1  ;;  %v2214_v54 = vunpack.i.l.bf16 %v2213_v1  ;;  %v2220_v55 = vunpack.i.h.bf16 %v2218_v49  ;;  %v2219_v57 = vunpack.i.l.bf16 %v2218_v49 }
 0x4ba   : > { %2277 = vrot.lane.b32.xlu1 %v2276_v28, %s2581_s10 }
 0x4bb   : > { %v2286_v59 = vpack.i.bf16 %v2219_v57, %v2189_v60  ;;  %v796_v56 = vsel %vm793_vm9, %v2210_v58, %v2214_v54  ;;  %v797_v2 = vsel %vm793_vm9, %v2214_v54, %v2215_v52  ;;  %v778_v3 = vsel %vm533_vm15, %v2219_v57, %v2220_v55 }
 0x4bc   : > { %v2228_v61 = vpop.permute.xlu1 %2227  ;;  %v2223_v62 = vpop.permute.xlu0 %2222  ;;  %v2296_v8 = vpack.i.bf16 %v797_v2, %v796_v56  ;;  %v2301_v9 = vpack.i.bf16 %v2220_v55, %v778_v3 }
 0x4bd   : > { %v2229_v4 = vunpack.i.l.bf16 %v2228_v61  ;;  %v2225_v6 = vunpack.i.h.bf16 %v2223_v62  ;;  %v2224_v7 = vunpack.i.l.bf16 %v2223_v62  ;;  %2287 = vrot.lane.b32.xlu0 %v2286_v59, %s2581_s10  ;;  %v2230_v5 = vunpack.i.h.bf16 %v2228_v61 }
 0x4be   : > { %2292 = vrot.lane.b32.xlu1 %v2291_v63, %s2581_s10 }
 0x4bf   : > { %v817_v14 = vsel %vm816_vm12, %v2224_v7, %v2225_v6  ;;  %v818_v15 = vsel %vm816_vm12, %v2225_v6, %v2229_v4  ;;  %v2321_v27 = vpack.i.bf16 %v2230_v5, %v2224_v7 }
 0x4c0   : > { %v2233_v60 = vpop.permute.xlu0 %2232  ;;  %v2238_v17 = vpop.permute.xlu1 %2237  ;;  %v2311_v21 = vpack.i.bf16 %v818_v15, %v817_v14 }
 0x4c1   : > { %v2235_v18 = vunpack.i.h.bf16 %v2233_v60  ;;  %v2234_v0 = vunpack.i.l.bf16 %v2233_v60  ;;  %2297 = vrot.lane.b32.xlu0 %v2296_v8, %s2581_s10  ;;  %v2240_v33 = vunpack.i.h.bf16 %v2238_v17  ;;  %v2239_v35 = vunpack.i.l.bf16 %v2238_v17 }
 0x4c2   : > { %2302 = vrot.lane.b32.xlu1 %v2301_v9, %s2581_s10 }
 0x4c3   : > { %v819_v24 = vsel %vm816_vm12, %v2230_v5, %v2234_v0  ;;  %v820_v25 = vsel %vm816_vm12, %v2234_v0, %v2235_v18  ;;  %v911_v48 = vsel %vm909_vm13, %v2239_v35, %v2240_v33 }
 0x4c4   : > { %v2248_v23 = vpop.permute.xlu0 %2247  ;;  %v2243_v26 = vpop.permute.xlu1 %2242  ;;  %v2316_v32 = vpack.i.bf16 %v820_v25, %v819_v24 }
 0x4c5   : > { %2312 = vrot.lane.b32.xlu0 %v2311_v21, %s2581_s10  ;;  %v2244_v36 = vunpack.i.l.bf16 %v2243_v26  ;;  %v2245_v38 = vunpack.i.h.bf16 %v2243_v26  ;;  %v2250_v55 = vunpack.i.h.bf16 %v2248_v23  ;;  %v2249_v57 = vunpack.i.l.bf16 %v2248_v23 }
 0x4c6   : > { %2307 = vrot.lane.b32.xlu1 %v2306_v22, %s2581_s10 }
 0x4c7   : > { %v910_v1 = vsel %vm909_vm13, %v2244_v36, %v2239_v35  ;;  %v915_v7 = vsel %vm909_vm13, %v2249_v57, %v2250_v55 }
 0x4c8   : > { %v2905_v31 = vpop.permute.xlu0 %2257 }
 0x4c9   : > { %2322 = vrot.lane.b32.xlu0 %v2321_v27, %s2581_s10  ;;  %v2259_v33 = vunpack.i.l.bf16 %v2905_v31 }
 0x4ca   : > { %2317 = vrot.lane.b32.xlu1 %v2316_v32, %s2581_s10  ;;  %v2260_v32 = vunpack.i.h.bf16 %v2905_v31 }
 0x4cc   : > { %v2263_v42 = vpop.permute.xlu0 %2262 }
 0x4cd   : > { %v2265_v44 = vunpack.i.h.bf16 %v2263_v42  ;;  %v2264_v43 = vunpack.i.l.bf16 %v2263_v42 }
 0x4ce   : > { %828 = vperm.xlu1 %2154, %v1840_v41  }
 0x4cf   : > { %v913_v49 = vsel %vm909_vm13, %v2264_v43, %v2265_v44  ;;  %v912_v28 = vsel %vm909_vm13, %v2245_v38, %v2264_v43 }
 0x4d0   : > { %v1879_v50 = vpack.c.bf16 %v913_v49, %v911_v48  ;;  %v1881_v51 = vpack.c.bf16 %v912_v28, %v910_v1  ;;  %v923_v28 = vsel %vm909_vm13, %v2259_v33, %v2260_v32 }
 0x4d2   : > { %1880 = vmatprep.subr.bf16.mxu1 %v1879_v50 }
 0x4d3   : > { %1882 = vmatpush1.bf16.msra.mxu1 %v1881_v51 }
 0x524   : > { %v2268_v52 = vpop.permute.xlu0 %2267  ;;  %v2253_v54 = vpop.permute.xlu1 %2252 }
 0x525   : > { %v2269_v58 = vunpack.i.l.bf16 %v2268_v52  ;;  %v2270_v59 = vunpack.i.h.bf16 %v2268_v52  ;;  %v2255_v61 = vunpack.i.h.bf16 %v2253_v54  ;;  %v2254_v62 = vunpack.i.l.bf16 %v2253_v54 }
 0x527   : > { %v914_v9 = vsel %vm909_vm13, %v2269_v58, %v2249_v57  ;;  %v919_v21 = vsel %vm909_vm13, %v2254_v62, %v2255_v61 }
 0x528   : > { %v2283_v63 = vpop.permute.xlu0 %2282  ;;  %v2273_v56 = vpop.permute.xlu1 %2272 }
 0x529   : > { %v2285_v2 = vunpack.i.h.bf16 %v2283_v63  ;;  %v2284_v3 = vunpack.i.l.bf16 %v2283_v63  ;;  %v2275_v4 = vunpack.i.h.bf16 %v2273_v56  ;;  %v2274_v6 = vunpack.i.l.bf16 %v2273_v56 }
 0x52b   : > { %v917_v8 = vsel %vm909_vm13, %v2274_v6, %v2275_v4  ;;  %v916_v60 = vsel %vm909_vm13, %v2270_v59, %v2274_v6  ;;  %v921_v14 = vsel %vm909_vm13, %v2284_v3, %v2285_v2 }
 0x52c   : > { %v2278_v15 = vpop.permute.xlu1 %2277  ;;  %v1883_v17 = vpack.c.bf16 %v917_v8, %v915_v7  ;;  %v1885_v18 = vpack.c.bf16 %v916_v60, %v914_v9  ;;  %v1887_v22 = vpack.c.bf16 %v921_v14, %v919_v21 }
 0x52d   : > { %v2280_v0 = vunpack.i.h.bf16 %v2278_v15  ;;  %v2279_v5 = vunpack.i.l.bf16 %v2278_v15 }
 0x52e   : > { %1884 = vmatprep.subr.bf16.mxu1 %v1883_v17 }
 0x52f   : > { %v2288_v23 = vpop.permute.xlu0 %2287  ;;  %1886 = vmatpush1.bf16.msra.mxu1 %v1885_v18  ;;  %v918_v24 = vsel %vm909_vm13, %v2279_v5, %v2254_v62  ;;  %v920_v25 = vsel %vm909_vm13, %v2280_v0, %v2284_v3 }
 0x530   : > { %1888 = vmatprep.subr.bf16.mxu1 %v1887_v22  ;;  %v2293_v26 = vpop.permute.xlu1 %2292  ;;  %v1889_v27 = vpack.c.bf16 %v920_v25, %v918_v24  ;;  %v2289_v35 = vunpack.i.l.bf16 %v2288_v23  ;;  %v2290_v38 = vunpack.i.h.bf16 %v2288_v23  ;;  %v1839_v23 = vld [vmem:[%s3162_s1 + $0x4] sm:$0xf] }
 0x531   : > { %v2295_v43 = vunpack.i.h.bf16 %v2293_v26  ;;  %v2294_v48 = vunpack.i.l.bf16 %v2293_v26  ;;  %v2942_v24 = vld [vmem:[#allocation2] sm:$0xff] }
 0x532   : > { %v922_v52 = vsel %vm909_vm13, %v2289_v35, %v2259_v33 }
 0x533   : > { %v2298_v36 = vpop.permute.xlu0 %2297  ;;  %1890 = vmatpush1.bf16.msra.mxu1 %v1889_v27  ;;  %v927_v62 = vsel %vm909_vm13, %v2294_v48, %v2295_v43 }
 0x534   : > { %v2300_v41 = vunpack.i.h.bf16 %v2298_v36  ;;  %v2299_v42 = vunpack.i.l.bf16 %v2298_v36  ;;  %v2303_v44 = vpop.permute.xlu1 %2302 }
 0x535   : > { %v2305_v1 = vunpack.i.h.bf16 %v2303_v44  ;;  %v2304_v49 = vunpack.i.l.bf16 %v2303_v44 }
 0x536   : > { %v929_v54 = vsel %vm909_vm13, %v2299_v42, %v2300_v41  ;;  %v1841_v41 = vld [vmem:[%s3163_s2 + $0x18] sm:$0xff] }
 0x537   : > { %v2313_v50 = vpop.permute.xlu0 %2312  ;;  %v925_v51 = vsel %vm909_vm13, %v2304_v49, %v2305_v1  ;;  %v924_v31 = vsel %vm909_vm13, %v2290_v38, %v2304_v49  ;;  %v1895_v63 = vpack.c.bf16 %v929_v54, %v927_v62 }
 0x538   : > { %v2308_v55 = vpop.permute.xlu1 %2307  ;;  %v1891_v57 = vpack.c.bf16 %v925_v51, %v923_v28  ;;  %v1893_v58 = vpack.c.bf16 %v924_v31, %v922_v52  ;;  %v2315_v56 = vunpack.i.h.bf16 %v2313_v50  ;;  %v2314_v2 = vunpack.i.l.bf16 %v2313_v50 }
 0x539   : > { %v2310_v59 = vunpack.i.h.bf16 %v2308_v55  ;;  %v2309_v61 = vunpack.i.l.bf16 %v2308_v55 }
 0x53a   : > { %1892 = vmatprep.subr.bf16.mxu1 %v1891_v57  ;;  %v931_v18 = vsel %vm909_vm13, %v2314_v2, %v2315_v56 }
 0x53b   : > { %v2323_v3 = vpop.permute.xlu0 %2322  ;;  %1894 = vmatpush1.bf16.msra.mxu1 %v1893_v58  ;;  %v926_v4 = vsel %vm909_vm13, %v2309_v61, %v2294_v48  ;;  %v928_v6 = vsel %vm909_vm13, %v2310_v59, %v2299_v42 }
 0x53c   : > { %v2325_v7 = vunpack.i.h.bf16 %v2323_v3  ;;  %v2324_v8 = vunpack.i.l.bf16 %v2323_v3  ;;  %v2318_v9 = vpop.permute.xlu1 %2317  ;;  %1896 = vmatprep.subr.bf16.mxu1 %v1895_v63  ;;  %v1897_v60 = vpack.c.bf16 %v928_v6, %v926_v4 }
 0x53d   : > { %v2320_v14 = vunpack.i.h.bf16 %v2318_v9  ;;  %v2319_v15 = vunpack.i.l.bf16 %v2318_v9 }
 0x53e   : > { %v930_v17 = vsel %vm909_vm13, %v2324_v8, %v2314_v2 }
 0x53f   : > { %1898 = vmatpush1.bf16.msra.mxu1 %v1897_v60  ;;  %v933_v0 = vsel %vm909_vm13, %v2319_v15, %v2320_v14  ;;  %v932_v5 = vsel %vm909_vm13, %v2325_v7, %v2319_v15 }
 0x540   : > { %v1899_v21 = vpack.c.bf16 %v933_v0, %v931_v18  ;;  %v1901_v22 = vpack.c.bf16 %v932_v5, %v930_v17  ;;  %v2959_v18 = vpack.i.bf16 %v2942_v24, %v2942_v24 }
 0x542   : > { %1900 = vmatprep.subr.bf16.mxu1 %v1899_v21 }
 0x543   : > { %1902 = vmatpush1.bf16.msra.mxu1 %v1901_v22 }
 0x546   : > { %1842 = vmatmul.mubr.msk.f32.vlgmr.msra.gmra.mrb[0].mxu1 %vm533_vm15, %v1839_v23 }
 0x547   : > { %1709 = vmatprep.mubr.f32.mxu1 %v2942_v24 }
 0x54d   : > { %v829_v25 = vpop.permute.xlu1 %828 }
 0x54e   : > { %v1052_v57 = vrot.slane %v829_v25, 4 }
 0x619   : > { %v1027_v26 = vpop.f32.mrb[0].mxu1 }
 0x61a   : > { %v1028_v27 = vadd.f32 %v1027_v26, %v829_v25  ;;  %v1029_v32 = vpop.f32.mrb[1].mxu1 }
 0x61b   : > { %v1030_v33 = vadd.f32 %v1029_v32, %v829_v25 }
 0x61c   : > { %v1032_v35 = vsel %vm608_vm0, %v1028_v27, 0.0 }
 0x61d   : > { %v1033_v36 = vsel %vm608_vm0, %v1030_v33, 0.0 }
 0x61e   : > { %v1034_v38 = vadd.f32 %v1033_v36, %v1032_v35 }
 0x620   : > { %1035 = vadd.xlane.f32.xlu0 %v1034_v38 }
 0x636   : > { %1058 = vperm.xlu0 %2155, %v1841_v41  }
 0x6ad   : > { %v1036_v42 = vpop.xlane.xlu0 %1035 }
 0x6ae   : > { %v1037_v44 = vmul.f32 0.00390625, %v1036_v42 }
 0x6b0   : > { %v1038_v43 = vsub.f32 %v1028_v27, %v1037_v44  ;;  %v1039_v48 = vsub.f32 %v1030_v33, %v1037_v44 }
 0x6b2   : > { %v1040_v1 = vmul.f32 %v1038_v43, %v1038_v43  ;;  %v1041_v49 = vmul.f32 %v1039_v48, %v1039_v48 }
 0x6b4   : > { %v1042_v28 = vsel %vm608_vm0, %v1040_v1, 0.0  ;;  %v1043_v50 = vsel %vm608_vm0, %v1041_v49, 0.0 }
 0x6b5   : > { %v1044_v51 = vadd.f32 %v1043_v50, %v1042_v28  ;;  %v1059_v63 = vpop.permute.xlu0 %1058 }
 0x6b7   : > { %1045 = vadd.xlane.f32.xlu1 %v1044_v51 }
 0x744   : > { %v1046_v52 = vpop.xlane.xlu1 %1045 }
 0x745   : > { %v1047_v31 = vmul.f32 0.00390625, %v1046_v52 }
 0x747   : > { %v1048_v54 = vadd.f32 1e-05, %v1047_v31 }
 0x749   : > { %2549 = vrsqrt.f32 %v1048_v54 }
 0x753   : > { %v2550_v55 = vpop.eup %2549 }
 0x754   : > { %v1050_v58 = vmul.f32 %v2550_v55, %v1038_v43  ;;  %v1051_v59 = vmul.f32 %v2550_v55, %v1039_v48 }
 0x756   : > { %v1055_v61 = vmul.f32 %v1052_v57, %v1051_v59  ;;  %v1054_v62 = vmul.f32 %v1052_v57, %v1050_v58 }
 0x758   : > { %v1062_v56 = vadd.f32 %v1059_v63, %v1055_v61  ;;  %v1061_v2 = vadd.f32 %v1059_v63, %v1054_v62 }
 0x75a   : > { %v1068_v3 = vrot.slane %v1062_v56, 4  ;;  %v1067_v4 = vrot.slane %v1061_v2, 4  ;;  %vm1064_vm14 = vcmp.ge.f32.partialorder %v1062_v56, 0.0  ;;  %vm1063_vm1 = vcmp.ge.f32.partialorder %v1061_v2, 0.0 }
 0x75c   : > { %v1072_v6 = vmul.f32 %v1068_v3, %v1059_v63  ;;  %v1071_v7 = vmul.f32 %v1067_v4, %v1059_v63 }
 0x75e   : > { %v1076_v8 = vrot.slane %v1072_v6, 4  ;;  %v1075_v9 = vrot.slane %v1071_v7, 4 }
 0x760   : > { %v1080_v60 = vsel %vm1064_vm14, %v1062_v56, %v1076_v8  ;;  %v1079_v14 = vsel %vm1063_vm1, %v1061_v2, %v1075_v9 }
 0x761   : > { %v1084_v15 = vrot.slane %v1080_v60, 4  ;;  %v1083_v17 = vrot.slane %v1079_v14, 4 }
 0x763   : > { %1087 = vrot.lane.b32.xlu0 %v1084_v15, %s2567_s18  ;;  %1085 = vrot.lane.b32.xlu1 %v1083_v17, %s2567_s18 }
 0x767   : > { %2332 = vrot.lane.b32.xlu0 %v2648_v13, %s2582_s21  ;;  %2327 = vrot.lane.b32.xlu1 %v2636_v10, %s2583_s24 }
 0x76b   : > { %2337 = vrot.lane.b32.xlu0 %v2819_v20, %s2571_s22  ;;  %2342 = vrot.lane.b32.xlu1 %v2959_v18, %s2571_s22 }
 0x7d5   : > { %v1088_v0 = vpop.permute.xlu0 %1087  ;;  %v1086_v5 = vpop.permute.xlu1 %1085 }
 0x7d6   : > { %1095 = vst.msk [vmem:[#allocation2 + $0x18] sm:$0xf0] %vm195_vm7, %v1088_v0  ;;  %v1089_v21 = vsel %vm187_vm6, %v1086_v5, %v1088_v0  ;;  %vm1239_vm7 = vcmask 506880  }
 0x7d7   : > { %1093 = vst.msk [vmem:[#allocation2 + $0x8] sm:$0xf0] %vm192_vm5, %v1086_v5  ;;  %1094 = vst [vmem:[#allocation2 + $0x10] sm:$0xf0] %v1089_v21  ;;  %vm1216_vm5 = vcmask 515072  }
 0x7d9   : > { %v2333_v10 = vpop.permute.xlu0 %2332  ;;  %v2328_v13 = vpop.permute.xlu1 %2327 }
 0x7da   : > { %v2335_v22 = vunpack.i.h.bf16 %v2333_v10  ;;  %v2334_v23 = vunpack.i.l.bf16 %v2333_v10  ;;  %v2330_v25 = vunpack.i.h.bf16 %v2328_v13  ;;  %v2329_v20 = vunpack.i.l.bf16 %v2328_v13 }
 0x7dc   : > { %v1122_v26 = vsel %vm1121_vm8, %v2329_v20, %v2330_v25  ;;  %v1126_v27 = vmul.f32 %v2942_v24, %v2329_v20  ;;  %v1107_v33 = vsel %vm1106_vm2, %v2334_v23, %v2335_v22  ;;  %v1131_v36 = vmul.f32 %v2330_v25, %v2815_v19 }
 0x7dd   : > { %v1130_v35 = vmul.f32 %v1122_v26, %v2813_v16  ;;  %v1136_v31 = vld [vmem:[#allocation2 + $0x18] sm:$0xff]  ;;  %v1111_v61 = vmul.f32 %v2942_v24, %v2334_v23  ;;  %v2338_v62 = vpop.permute.xlu0 %2337  ;;  %v1115_v56 = vmul.f32 %v1107_v33, %v2813_v16  ;;  %v1116_v2 = vmul.f32 %v2335_v22, %v2815_v19 }
 0x7de   : > { %v1097_v32 = vld [vmem:[#allocation2 + $0x8] sm:$0xff]  ;;  %v1098_v38 = vld [vmem:[#allocation2 + $0x10] sm:$0xff]  ;;  %v2351_v41 = vpack.i.bf16 %v1126_v27, %v1126_v27  ;;  %v2376_v54 = vpack.i.bf16 %v2813_v16, %v1136_v31  ;;  %v2340_v3 = vunpack.i.h.bf16 %v2338_v62  ;;  %v2339_v4 = vunpack.i.l.bf16 %v2338_v62 }
 0x7df   : > { %v2346_v42 = vpack.i.bf16 %v1131_v36, %v1130_v35  ;;  %v2972_v44 = vmul.f32 %v1107_v33, %v1097_v32  ;;  %v2974_v43 = vmul.f32 %v2335_v22, %v1098_v38  ;;  %v2361_v48 = vpack.i.bf16 %v1098_v38, %v1097_v32 }
 0x7e0   : > { %2352 = vrot.lane.b32.xlu0 %v2351_v41, %s2572_s23  ;;  %v1127_v1 = vmul.f32 %v1122_v26, %v1097_v32  ;;  %v1128_v49 = vmul.f32 %v2330_v25, %v1098_v38  ;;  %v1132_v51 = vmul.f32 %v2639_v11, %v1097_v32  ;;  %v1133_v52 = vmul.f32 %v2642_v12, %v1098_v38 }
 0x7e1   : > { %2347 = vrot.lane.b32.xlu1 %v2346_v42, %s2572_s23  ;;  %v2431_v28 = vpack.i.bf16 %v2974_v43, %v2972_v44  ;;  %v1138_v57 = vmul.f32 %v2680_v40, %v1097_v32  ;;  %v1139_v58 = vmul.f32 %v1098_v38, %v2688_v46  ;;  %v2411_v6 = vpack.i.bf16 %v1111_v61, %v1111_v61 }
 0x7e2   : > { %v2371_v50 = vpack.i.bf16 %v1128_v49, %v1127_v1  ;;  %v2381_v55 = vpack.i.bf16 %v1133_v52, %v1132_v51  ;;  %v2406_v7 = vpack.i.bf16 %v1116_v2, %v1115_v56  ;;  %v1165_v8 = vsel %vm314_vm10, %v2339_v4, %v2340_v3 }
 0x7e3   : > { %v2396_v59 = vpack.i.bf16 %v1139_v58, %v1138_v57 }
 0x7e4   : > { %2357 = vrot.lane.b32.xlu0 %v2847_v47, %s2582_s21  ;;  %v1140_v47 = vmul.f32 %v2678_v39, %v1136_v31 }
 0x7e5   : > { %2362 = vrot.lane.b32.xlu1 %v2361_v48, %s2571_s22 }
 0x7e6   : > { %v2391_v63 = vpack.i.bf16 %v2851_v37, %v1140_v47  ;;  %v2343_v37 = vpop.permute.xlu1 %2342 }
 0x7e7   : > { %v2345_v14 = vunpack.i.h.bf16 %v2343_v37  ;;  %v2344_v15 = vunpack.i.l.bf16 %v2343_v37 }
 0x7e8   : > { %2372 = vrot.lane.b32.xlu0 %v2371_v50, %s2572_s23 }
 0x7e9   : > { %2367 = vrot.lane.b32.xlu1 %v2361_v48, %s2584_s25  ;;  %v1164_v23 = vsel %vm314_vm10, %v2345_v14, %v2339_v4 }
 0x7ec   : > { %2377 = vrot.lane.b32.xlu0 %v2376_v54, %s2584_s25 }
 0x7ed   : > { %2382 = vrot.lane.b32.xlu1 %v2381_v55, %s2582_s21 }
 0x7f0   : > { %2397 = vrot.lane.b32.xlu0 %v2396_v59, %s2585_s26 }
 0x7f1   : > { %2387 = vrot.lane.b32.xlu1 %v2845_v45, %s2584_s25  ;;  %v2416_v45 = vpack.i.bf16 %v2340_v3, %v1165_v8 }
 0x7f4   : > { %2402 = vrot.lane.b32.xlu0 %v2868_v53, %s2585_s26 }
 0x7f5   : > { %2392 = vrot.lane.b32.xlu1 %v2391_v63, %s2585_s26 }
 0x7f8   : > { %2407 = vrot.lane.b32.xlu0 %v2406_v7, %s2582_s21 }
 0x7f9   : > { %2412 = vrot.lane.b32.xlu1 %v2411_v6, %s2582_s21 }
 0x7fd   : > { %2417 = vrot.lane.b32.xlu1 %v2416_v45, %s2582_s21 }
 0x852   : > { %v2353_v16 = vpop.permute.xlu0 %2352 }
 0x853   : > { %v2348_v9 = vpop.permute.xlu1 %2347  ;;  %v2355_v38 = vunpack.i.h.bf16 %v2353_v16  ;;  %v2354_v41 = vunpack.i.l.bf16 %v2353_v16 }
 0x854   : > { %v2350_v19 = vunpack.i.h.bf16 %v2348_v9  ;;  %v2349_v60 = vunpack.i.l.bf16 %v2348_v9 }
 0x856   : > { %v1187_v53 = vsel %vm337_vm11, %v2349_v60, %v2350_v19  ;;  %v2358_v0 = vpop.permute.xlu0 %2357  ;;  %v1186_v31 = vsel %vm337_vm11, %v2355_v38, %v2349_v60 }
 0x857   : > { %v2421_v17 = vpack.i.bf16 %v2350_v19, %v1187_v53  ;;  %v2363_v5 = vpop.permute.xlu1 %2362  ;;  %v2360_v21 = vunpack.i.h.bf16 %v2358_v0  ;;  %v2359_v10 = vunpack.i.l.bf16 %v2358_v0 }
 0x858   : > { %v2365_v13 = vunpack.i.h.bf16 %v2363_v5  ;;  %v2364_v22 = vunpack.i.l.bf16 %v2363_v5 }
 0x859   : > { %2422 = vrot.lane.b32.xlu0 %v2421_v17, %s2582_s21  ;;  %v1201_v25 = vsel %vm1106_vm2, %v2359_v10, %v2360_v21 }
 0x85a   : > { %v1162_v20 = vsel %vm314_vm10, %v2344_v15, %v2364_v22  ;;  %v2426_v26 = vpack.i.bf16 %v2360_v21, %v1201_v25  ;;  %v2373_v32 = vpop.permute.xlu0 %2372  ;;  %v1163_v35 = vsel %vm314_vm10, %v2364_v22, %v2365_v13  ;;  %v1844_v25 = vld [vmem:[%s3163_s2 + $0x20] sm:$0xff] }
 0x85b   : > { %v2436_v27 = vpack.i.bf16 %v1164_v23, %v1162_v20  ;;  %v2368_v33 = vpop.permute.xlu1 %2367  ;;  %v2374_v36 = vunpack.i.l.bf16 %v2373_v32  ;;  %v2441_v42 = vpack.i.bf16 %v2365_v13, %v1163_v35  ;;  %v2375_v48 = vunpack.i.h.bf16 %v2373_v32 }
 0x85c   : > { %2427 = vrot.lane.b32.xlu1 %v2426_v26, %s2582_s21  ;;  %v2370_v44 = vunpack.i.h.bf16 %v2368_v33  ;;  %v2369_v43 = vunpack.i.l.bf16 %v2368_v33 }
 0x85d   : > { %2437 = vrot.lane.b32.xlu0 %v2436_v27, %s2582_s21  ;;  %v1184_v50 = vsel %vm337_vm11, %v2354_v41, %v2374_v36  ;;  %v1185_v55 = vsel %vm337_vm11, %v2374_v36, %v2375_v48 }
 0x85e   : > { %v2378_v1 = vpop.permute.xlu0 %2377  ;;  %v2451_v57 = vpack.i.bf16 %v1186_v31, %v1184_v50  ;;  %v2456_v56 = vpack.i.bf16 %v2375_v48, %v1185_v55  ;;  %v1217_v37 = vsel %vm1216_vm5, %v2369_v43, %v2370_v44 }
 0x85f   : > { %v2383_v49 = vpop.permute.xlu1 %2382  ;;  %v2379_v59 = vunpack.i.l.bf16 %v2378_v1 }
 0x860   : > { %v2385_v51 = vunpack.i.h.bf16 %v2383_v49  ;;  %v2384_v52 = vunpack.i.l.bf16 %v2383_v49  ;;  %2432 = vrot.lane.b32.xlu1 %v2431_v28, %s2582_s21  ;;  %v2380_v28 = vunpack.i.h.bf16 %v2378_v1 }
 0x861   : > { %2442 = vrot.lane.b32.xlu0 %v2441_v42, %s2582_s21  ;;  %v1218_v4 = vsel %vm1216_vm5, %v2370_v44, %v2379_v59 }
 0x862   : > { %v2446_v54 = vpack.i.bf16 %v2359_v10, %v2384_v52  ;;  %v2398_v58 = vpop.permute.xlu0 %2397  ;;  %v1200_v61 = vsel %vm1106_vm2, %v2384_v52, %v2385_v51  ;;  %v2461_v19 = vpack.i.bf16 %v1218_v4, %v1217_v37  ;;  %v2476_v5 = vpack.i.bf16 %v2380_v28, %v2369_v43 }
 0x863   : > { %v2388_v47 = vpop.permute.xlu1 %2387  ;;  %v2466_v2 = vpack.i.bf16 %v2385_v51, %v1200_v61  ;;  %v2400_v16 = vunpack.i.h.bf16 %v2398_v58  ;;  %v2399_v9 = vunpack.i.l.bf16 %v2398_v58 }
 0x864   : > { %v2390_v62 = vunpack.i.h.bf16 %v2388_v47  ;;  %v2389_v63 = vunpack.i.l.bf16 %v2388_v47  ;;  %2452 = vrot.lane.b32.xlu1 %v2451_v57, %s2582_s21 }
 0x865   : > { %2447 = vrot.lane.b32.xlu0 %v2446_v54, %s2582_s21  ;;  %v1240_v0 = vsel %vm1239_vm7, %v2399_v9, %v2400_v16 }
 0x866   : > { %v1219_v6 = vsel %vm1216_vm5, %v2380_v28, %v2389_v63  ;;  %v1220_v7 = vsel %vm1216_vm5, %v2389_v63, %v2390_v62  ;;  %v2403_v45 = vpop.permute.xlu0 %2402 }
 0x867   : > { %v2393_v3 = vpop.permute.xlu1 %2392  ;;  %v2471_v60 = vpack.i.bf16 %v1220_v7, %v1219_v6  ;;  %v2405_v14 = vunpack.i.h.bf16 %v2403_v45  ;;  %v2404_v53 = vunpack.i.l.bf16 %v2403_v45 }
 0x868   : > { %v2394_v8 = vunpack.i.l.bf16 %v2393_v3  ;;  %2457 = vrot.lane.b32.xlu1 %v2456_v56, %s2582_s21  ;;  %v2395_v15 = vunpack.i.h.bf16 %v2393_v3 }
 0x869   : > { %2467 = vrot.lane.b32.xlu0 %v2466_v2, %s2582_s21  ;;  %v1243_v10 = vsel %vm1239_vm7, %v2404_v53, %v2405_v14 }
 0x86a   : > { %v1241_v17 = vsel %vm1239_vm7, %v2400_v16, %v2394_v8  ;;  %v1242_v13 = vsel %vm1239_vm7, %v2395_v15, %v2404_v53  ;;  %v2491_v23 = vpack.i.bf16 %v2395_v15, %v2399_v9  ;;  %v2408_v26 = vpop.permute.xlu0 %2407 }
 0x86b   : > { %v2486_v21 = vpack.i.bf16 %v1241_v17, %v1240_v0  ;;  %v2481_v22 = vpack.i.bf16 %v1243_v10, %v1242_v13  ;;  %v2413_v20 = vpop.permute.xlu1 %2412  ;;  %v2410_v36 = vunpack.i.h.bf16 %v2408_v26  ;;  %v2409_v38 = vunpack.i.l.bf16 %v2408_v26 }
 0x86c   : > { %2462 = vrot.lane.b32.xlu1 %v2461_v19, %s2582_s21  ;;  %v2415_v41 = vunpack.i.h.bf16 %v2413_v20  ;;  %v2414_v1 = vunpack.i.l.bf16 %v2413_v20 }
 0x86d   : > { %2472 = vrot.lane.b32.xlu0 %v2471_v60, %s2582_s21  ;;  %v1335_v58 = vsel %vm1106_vm2, %v2409_v38, %v2410_v36 }
 0x86e   : > { %v1334_v55 = vsel %vm1106_vm2, %v2415_v41, %v2409_v38 }
 0x86f   : > { %v2418_v27 = vpop.permute.xlu1 %2417 }
 0x870   : > { %2477 = vrot.lane.b32.xlu1 %v2476_v5, %s2582_s21  ;;  %v2420_v42 = vunpack.i.h.bf16 %v2418_v27  ;;  %v2419_v48 = vunpack.i.l.bf16 %v2418_v27 }
 0x871   : > { %2487 = vrot.lane.b32.xlu0 %v2486_v21, %s2582_s21 }
 0x872   : > { %v1339_v47 = vsel %vm1106_vm2, %v2419_v48, %v2420_v42 }
 0x874   : > { %2482 = vrot.lane.b32.xlu1 %v2481_v22, %s2582_s21 }
 0x875   : > { %2492 = vrot.lane.b32.xlu0 %v2491_v23, %s2582_s21 }
 0x878   : > { %1251 = vperm.xlu1 %2154, %v1844_v25  }
 0x8cb   : > { %v2423_v32 = vpop.permute.xlu0 %2422 }
 0x8cc   : > { %v2425_v4 = vunpack.i.h.bf16 %v2423_v32  ;;  %v2424_v6 = vunpack.i.l.bf16 %v2423_v32 }
 0x8ce   : > { %v3031_v33 = vpop.permute.xlu1 %2427  ;;  %v1343_v5 = vsel %vm1106_vm2, %v2424_v6, %v2425_v4 }
 0x8cf   : > { %v2438_v35 = vpop.permute.xlu0 %2437  ;;  %v2430_v7 = vunpack.i.h.bf16 %v3031_v33  ;;  %v2429_v8 = vunpack.i.l.bf16 %v3031_v33 }
 0x8d0   : > { %v2440_v57 = vunpack.i.h.bf16 %v2438_v35  ;;  %v2439_v59 = vunpack.i.l.bf16 %v2438_v35 }
 0x8d1   : > { %v1347_v21 = vsel %vm1106_vm2, %v2429_v8, %v2430_v7 }
 0x8d2   : > { %v2433_v49 = vpop.permute.xlu1 %2432  ;;  %v1338_v45 = vsel %vm1106_vm2, %v2440_v57, %v2419_v48 }
 0x8d3   : > { %v2443_v50 = vpop.permute.xlu0 %2442  ;;  %v2435_v51 = vunpack.i.h.bf16 %v2433_v49  ;;  %v2434_v52 = vunpack.i.l.bf16 %v2433_v49 }
 0x8d4   : > { %v2445_v31 = vunpack.i.h.bf16 %v2443_v50  ;;  %v2444_v54 = vunpack.i.l.bf16 %v2443_v50 }
 0x8d5   : > { %v1332_v61 = vsel %vm1106_vm2, %v2414_v1, %v2434_v52  ;;  %v1333_v62 = vsel %vm1106_vm2, %v2434_v52, %v2435_v51 }
 0x8d6   : > { %v1337_v63 = vsel %vm1106_vm2, %v2444_v54, %v2445_v31  ;;  %v1905_v44 = vpack.c.bf16 %v1334_v55, %v1332_v61  ;;  %v2453_v43 = vpop.permute.xlu1 %2452  ;;  %v1903_v56 = vpack.c.bf16 %v1335_v58, %v1333_v62  ;;  %v1336_v3 = vsel %vm1106_vm2, %v2439_v59, %v2444_v54 }
 0x8d7   : > { %v2448_v28 = vpop.permute.xlu0 %2447  ;;  %v1907_v2 = vpack.c.bf16 %v1339_v47, %v1337_v63  ;;  %v2455_v37 = vunpack.i.h.bf16 %v2453_v43  ;;  %v1909_v16 = vpack.c.bf16 %v1338_v45, %v1336_v3  ;;  %v2454_v9 = vunpack.i.l.bf16 %v2453_v43  ;;  %v1843_v45 = vld [vmem:[%s3162_s1 + $0x8] sm:$0xf] }
 0x8d8   : > { %1904 = vmatprep.subr.bf16.mxu0 %v1903_v56  ;;  %v2450_v0 = vunpack.i.h.bf16 %v2448_v28  ;;  %v2449_v25 = vunpack.i.l.bf16 %v2448_v28 }
 0x8d9   : > { %1906 = vmatpush1.bf16.msra.mxu0 %v1905_v44  ;;  %v1342_v10 = vsel %vm1106_vm2, %v2455_v37, %v2424_v6 }
 0x8da   : > { %1908 = vmatprep.subr.bf16.mxu0 %v1907_v2  ;;  %v2458_v19 = vpop.permute.xlu1 %2457  ;;  %v1346_v49 = vsel %vm1106_vm2, %v2450_v0, %v2429_v8 }
 0x8db   : > { %v2468_v60 = vpop.permute.xlu0 %2467  ;;  %v2460_v14 = vunpack.i.h.bf16 %v2458_v19  ;;  %v2459_v53 = vunpack.i.l.bf16 %v2458_v19 }
 0x8dc   : > { %v2470_v15 = vunpack.i.h.bf16 %v2468_v60  ;;  %v2469_v17 = vunpack.i.l.bf16 %v2468_v60 }
 0x8dd   : > { %v1340_v13 = vsel %vm1106_vm2, %v2454_v9, %v2459_v53  ;;  %1910 = vmatpush1.bf16.msra.mxu0 %v1909_v16  ;;  %v1341_v22 = vsel %vm1106_vm2, %v2459_v53, %v2460_v14 }
 0x8de   : > { %v1345_v23 = vsel %vm1106_vm2, %v2469_v17, %v2470_v15  ;;  %v1913_v20 = vpack.c.bf16 %v1342_v10, %v1340_v13  ;;  %v2463_v26 = vpop.permute.xlu1 %2462  ;;  %v1911_v32 = vpack.c.bf16 %v1343_v5, %v1341_v22  ;;  %v1344_v42 = vsel %vm1106_vm2, %v2449_v25, %v2469_v17  ;;  %v1845_v17 = vld [vmem:[%s3163_s2 + $0x28] sm:$0xff] }
 0x8df   : > { %v2473_v27 = vpop.permute.xlu0 %2472  ;;  %v1915_v33 = vpack.c.bf16 %v1347_v21, %v1345_v23  ;;  %v2465_v35 = vunpack.i.h.bf16 %v2463_v26  ;;  %v2464_v36 = vunpack.i.l.bf16 %v2463_v26  ;;  %v1917_v31 = vpack.c.bf16 %v1346_v49, %v1344_v42 }
 0x8e0   : > { %v2475_v38 = vunpack.i.h.bf16 %v2473_v27  ;;  %v2474_v41 = vunpack.i.l.bf16 %v2473_v27  ;;  %1912 = vmatprep.subr.bf16.mxu0 %v1911_v32 }
 0x8e1   : > { %1914 = vmatpush1.bf16.msra.mxu0 %v1913_v20  ;;  %v1349_v48 = vsel %vm1106_vm2, %v2464_v36, %v2465_v35 }
 0x8e2   : > { %v1351_v1 = vsel %vm1106_vm2, %v2474_v41, %v2475_v38  ;;  %v2478_v50 = vpop.permute.xlu1 %2477  ;;  %1916 = vmatprep.subr.bf16.mxu0 %v1915_v33 }
 0x8e3   : > { %v2488_v51 = vpop.permute.xlu0 %2487  ;;  %v1919_v52 = vpack.c.bf16 %v1351_v1, %v1349_v48  ;;  %v2480_v54 = vunpack.i.h.bf16 %v2478_v50  ;;  %v2479_v55 = vunpack.i.l.bf16 %v2478_v50 }
 0x8e4   : > { %v2490_v47 = vunpack.i.h.bf16 %v2488_v51  ;;  %v2489_v59 = vunpack.i.l.bf16 %v2488_v51 }
 0x8e5   : > { %v1350_v57 = vsel %vm1106_vm2, %v2480_v54, %v2474_v41  ;;  %v1348_v58 = vsel %vm1106_vm2, %v2479_v55, %v2464_v36  ;;  %1918 = vmatpush1.bf16.msra.mxu0 %v1917_v31 }
 0x8e6   : > { %v1921_v61 = vpack.c.bf16 %v1350_v57, %v1348_v58  ;;  %v2483_v62 = vpop.permute.xlu1 %2482  ;;  %1920 = vmatprep.subr.bf16.mxu0 %v1919_v52  ;;  %v1353_v4 = vsel %vm1106_vm2, %v2489_v59, %v2490_v47  ;;  %v2556_v47 = vld [vmem:[#allocation2 + $0x28] sm:$0xff] }
 0x8e7   : > { %v2493_v63 = vpop.permute.xlu0 %2492  ;;  %v2485_v44 = vunpack.i.h.bf16 %v2483_v62  ;;  %v2484_v43 = vunpack.i.l.bf16 %v2483_v62  ;;  %v1541_v30 = vmul.f32 %v2556_v47, %v2680_v40 }
 0x8e8   : > { %v2495_v28 = vunpack.i.h.bf16 %v2493_v63  ;;  %v2494_v56 = vunpack.i.l.bf16 %v2493_v63 }
 0x8e9   : > { %1922 = vmatpush1.bf16.msra.mxu0 %v1921_v61  ;;  %v1355_v6 = vsel %vm1106_vm2, %v2484_v43, %v2485_v44 }
 0x8ea   : > { %v1352_v2 = vsel %vm1106_vm2, %v2494_v56, %v2489_v59  ;;  %v1354_v3 = vsel %vm1106_vm2, %v2495_v28, %v2484_v43  ;;  %v1923_v8 = vpack.c.bf16 %v1355_v6, %v1353_v4  ;;  %v2557_v59 = vld [vmem:[#allocation2 + $0x30] sm:$0xff]  ;;  %v1520_v43 = vmul.f32 %v2942_v24, %v2639_v11 }
 0x8eb   : > { %v1925_v7 = vpack.c.bf16 %v1354_v3, %v1352_v2  ;;  %v2496_v61 = vpack.i.bf16 %v2557_v59, %v2556_v47  ;;  %v1523_v3 = vmul.f32 %v2556_v47, %v2642_v12 }
 0x8ec   : > { %1924 = vmatprep.subr.bf16.mxu0 %v1923_v8  ;;  %v3085_v8 = vmul.f32 %v2556_v47, %v2639_v11 }
 0x8ed   : > { %1926 = vmatpush1.bf16.msra.mxu0 %v1925_v7  ;;  %v1929_v7 = vpack.c.bf16 %v1520_v43, %v1520_v43 }
 0x8f0   : > { %1846 = vmatmul.mubr.msk.f32.vlgmr.msra.gmra.mrb[2].mxu0 %vm533_vm15, %v1843_v45 }
 0x8f7   : > { %v1252_v37 = vpop.permute.xlu1 %1251 }
 0x8f8   : > { %v1474_v35 = vrot.slane %v1252_v37, 4 }
 0x9c3   : > { %v1449_v16 = vpop.f32.mrb[2].mxu0 }
 0x9c4   : > { %v1450_v9 = vadd.f32 %v1449_v16, %v1252_v37  ;;  %v1451_v19 = vpop.f32.mrb[3].mxu0  ;;  %v3091_v16 = vmul.f32 %v2557_v59, %v2642_v12 }
 0x9c5   : > { %v1452_v60 = vadd.f32 %v1451_v19, %v1252_v37 }
 0x9c6   : > { %v1454_v14 = vsel %vm608_vm0, %v1450_v9, 0.0 }
 0x9c7   : > { %v1455_v53 = vsel %vm608_vm0, %v1452_v60, 0.0 }
 0x9c8   : > { %v1456_v15 = vadd.f32 %v1455_v53, %v1454_v14 }
 0x9ca   : > { %1457 = vadd.xlane.f32.xlu0 %v1456_v15 }
 0x9e0   : > { %1480 = vperm.xlu0 %2155, %v1845_v17  }
 0xa57   : > { %v1458_v0 = vpop.xlane.xlu0 %1457 }
 0xa58   : > { %v1459_v5 = vmul.f32 0.00390625, %v1458_v0 }
 0xa5a   : > { %v1460_v21 = vsub.f32 %v1450_v9, %v1459_v5  ;;  %v1461_v10 = vsub.f32 %v1452_v60, %v1459_v5  ;;  %v1526_v60 = vmul.f32 %v2942_v24, %v2680_v40  ;;  %v1542_v5 = vmul.f32 %v2557_v59, %v2688_v46 }
 0xa5c   : > { %v1462_v13 = vmul.f32 %v1460_v21, %v1460_v21  ;;  %v1463_v22 = vmul.f32 %v1461_v10, %v1461_v10 }
 0xa5e   : > { %v1464_v23 = vsel %vm608_vm0, %v1462_v13, 0.0  ;;  %v1465_v25 = vsel %vm608_vm0, %v1463_v22, 0.0  ;;  %v1848_v22 = vld [vmem:[%s3163_s2 + $0x30] sm:$0xff] }
 0xa5f   : > { %v1466_v20 = vadd.f32 %v1465_v25, %v1464_v23  ;;  %v1481_v48 = vpop.permute.xlu0 %1480 }
 0xa61   : > { %1467 = vadd.xlane.f32.xlu1 %v1466_v20 }
 0xaee   : > { %v1468_v26 = vpop.xlane.xlu1 %1467 }
 0xaef   : > { %v1469_v27 = vmul.f32 0.00390625, %v1468_v26 }
 0xaf1   : > { %v1470_v32 = vadd.f32 1e-05, %v1469_v27 }
 0xaf3   : > { %2551 = vrsqrt.f32 %v1470_v32 }
 0xafd   : > { %v2552_v33 = vpop.eup %2551 }
 0xafe   : > { %v1473_v36 = vmul.f32 %v2552_v33, %v1461_v10  ;;  %v1472_v38 = vmul.f32 %v2552_v33, %v1460_v21 }
 0xb00   : > { %v1477_v41 = vmul.f32 %v1474_v35, %v1473_v36  ;;  %v1476_v42 = vmul.f32 %v1474_v35, %v1472_v38 }
 0xb02   : > { %v1484_v1 = vadd.f32 %v1481_v48, %v1477_v41  ;;  %v1483_v49 = vadd.f32 %v1481_v48, %v1476_v42 }
 0xb04   : > { %v1490_v50 = vrot.slane %v1484_v1, 4  ;;  %v1489_v51 = vrot.slane %v1483_v49, 4  ;;  %vm1486_vm9 = vcmp.ge.f32.partialorder %v1484_v1, 0.0  ;;  %vm1485_vm12 = vcmp.ge.f32.partialorder %v1483_v49, 0.0 }
 0xb06   : > { %v1494_v52 = vmul.f32 %v1490_v50, %v1481_v48  ;;  %v1493_v31 = vmul.f32 %v1489_v51, %v1481_v48 }
 0xb08   : > { %v1498_v54 = vrot.slane %v1494_v52, 4  ;;  %v1497_v55 = vrot.slane %v1493_v31, 4 }
 0xb0a   : > { %v1502_v57 = vsel %vm1486_vm9, %v1484_v1, %v1498_v54  ;;  %v1501_v58 = vsel %vm1485_vm12, %v1483_v49, %v1497_v55 }
 0xb0b   : > { %1507 = vrot.lane.b32.xlu0 %v1502_v57, %s2567_s18  ;;  %1505 = vrot.lane.b32.xlu1 %v1501_v58, %s2567_s18 }
 0xb0f   : > { %2497 = vrot.lane.b32.xlu0 %v2496_v61, %s2571_s22  ;;  %2502 = vrot.lane.b32.xlu1 %v2959_v18, %s2571_s22 }
 0xb7d   : > { %v1508_v62 = vpop.permute.xlu0 %1507  ;;  %v1506_v63 = vpop.permute.xlu1 %1505 }
 0xb7e   : > { %1515 = vst.msk [vmem:[#allocation2 + $0x18] sm:$0xf] %vm672_vm4, %v1508_v62  ;;  %v1509_v44 = vsel %vm187_vm6, %v1506_v63, %v1508_v62 }
 0xb7f   : > { %1513 = vst.msk [vmem:[#allocation2 + $0x8] sm:$0xf] %vm669_vm3, %v1506_v63  ;;  %1514 = vst [vmem:[#allocation2 + $0x10] sm:$0xf] %v1509_v44 }
 0xb85   : > { %v1536_v14 = vld [vmem:[#allocation2 + $0x18] sm:$0xff] }
 0xb86   : > { %v1517_v28 = vld [vmem:[#allocation2 + $0x8] sm:$0xff]  ;;  %v1524_v56 = vld [vmem:[#allocation2 + $0x10] sm:$0xff]  ;;  %v1540_v17 = vmul.f32 %v2678_v39, %v1536_v14 }
 0xb87   : > { %v1521_v2 = vmul.f32 %v2642_v12, %v1517_v28  ;;  %v1527_v18 = vmul.f32 %v1517_v28, %v2688_v46  ;;  %v2506_v4 = vpack.i.bf16 %v1524_v56, %v1517_v28  ;;  %v1528_v6 = vmul.f32 %v2678_v39, %v1524_v56 }
 0xb88   : > { %v3088_v37 = vmul.f32 %v2642_v12, %v1524_v56  ;;  %v3094_v9 = vmul.f32 %v2639_v11, %v1517_v28  ;;  %v1537_v12 = vld [vmem:[#allocation2 + $0x38] sm:$0xff]  ;;  %v2521_v11 = vpack.i.bf16 %v1526_v60, %v1526_v60  ;;  %v1539_v24 = vmul.f32 %v1524_v56, %v2688_v46  ;;  %v2503_v46 = vpop.permute.xlu1 %2502 }
 0xb89   : > { %v1927_v45 = vpack.c.bf16 %v1523_v3, %v1521_v2  ;;  %2507 = vrot.lane.b32.xlu1 %v2506_v4, %s2571_s22  ;;  %v2516_v19 = vpack.i.bf16 %v1528_v6, %v1527_v18  ;;  %v2526_v0 = vpack.i.bf16 %v1537_v12, %v1536_v14  ;;  %v1543_v21 = vmul.f32 %v2678_v39, %v1537_v12  ;;  %v2498_v39 = vpop.permute.xlu0 %2497 }
 0xb8a   : > { %v1939_v53 = vpack.c.bf16 %v3091_v16, %v3088_v37  ;;  %v1941_v15 = vpack.c.bf16 %v3085_v8, %v3094_v9  ;;  %v2536_v10 = vpack.i.bf16 %v1540_v17, %v1539_v24  ;;  %v1538_v13 = vmul.f32 %v2680_v40, %v1517_v28  ;;  %v1847_v17 = vld [vmem:[%s3162_s1 + $0xc] sm:$0xf] }
 0xb8b   : > { %1928 = vmatprep.subr.bf16.mxu1 %v1927_v45  ;;  %2517 = vrot.lane.b32.xlu0 %v2516_v19, %s2572_s23  ;;  %v2531_v29 = vpack.i.bf16 %v1543_v21, %v1542_v5  ;;  %v2500_v23 = vunpack.i.h.bf16 %v2498_v39  ;;  %v2499_v25 = vunpack.i.l.bf16 %v2498_v39  ;;  %v2505_v20 = vunpack.i.h.bf16 %v2503_v46 }
 0xb8c   : > { %1930 = vmatpush1.bf16.msra.mxu1 %v1929_v7  ;;  %v2504_v27 = vunpack.i.l.bf16 %v2503_v46 }
 0xb8d   : > { %2512 = vrot.lane.b32.xlu1 %v2511_v34, %s2572_s23  ;;  %v2541_v34 = vpack.i.bf16 %v1541_v30, %v1538_v13  ;;  %v1564_v40 = vsel %vm314_vm10, %v2505_v20, %v2499_v25  ;;  %v1565_v36 = vsel %vm314_vm10, %v2499_v25, %v2500_v23 }
 0xb8f   : > { %2522 = vrot.lane.b32.xlu0 %v2521_v11, %s2572_s23 }
 0xb91   : > { %2527 = vrot.lane.b32.xlu1 %v2526_v0, %s2571_s22 }
 0xb93   : > { %2537 = vrot.lane.b32.xlu0 %v2536_v10, %s2572_s23 }
 0xb95   : > { %2532 = vrot.lane.b32.xlu1 %v2531_v29, %s2572_s23  ;;  %v1849_v29 = vld [vmem:[%s3163_s2 + $0x38] sm:$0xff] }
 0xb97   : > { %2542 = vrot.lane.b32.xlu0 %v2541_v34, %s2572_s23 }
 0xb99   : > { %1639 = vperm.xlu1 %2154, %v1848_v22  }
 0xbfb   : > { %v2508_v26 = vpop.permute.xlu1 %2507 }
 0xbfc   : > { %v2510_v32 = vunpack.i.h.bf16 %v2508_v26  ;;  %v2509_v33 = vunpack.i.l.bf16 %v2508_v26 }
 0xbfd   : > { %v2518_v35 = vpop.permute.xlu0 %2517 }
 0xbfe   : > { %v1562_v38 = vsel %vm314_vm10, %v2504_v27, %v2509_v33  ;;  %v2520_v41 = vunpack.i.h.bf16 %v2518_v35  ;;  %v2519_v42 = vunpack.i.l.bf16 %v2518_v35  ;;  %v1563_v48 = vsel %vm314_vm10, %v2509_v33, %v2510_v32 }
 0xbff   : > { %v1933_v1 = vpack.c.bf16 %v1564_v40, %v1562_v38  ;;  %v2513_v49 = vpop.permute.xlu1 %2512  ;;  %v1931_v50 = vpack.c.bf16 %v1565_v36, %v1563_v48 }
 0xc00   : > { %v2515_v51 = vunpack.i.h.bf16 %v2513_v49  ;;  %v2514_v52 = vunpack.i.l.bf16 %v2513_v49  ;;  %v1589_v57 = vsel %vm337_vm11, %v2519_v42, %v2520_v41 }
 0xc01   : > { %v2523_v31 = vpop.permute.xlu0 %2522  ;;  %1932 = vmatprep.subr.bf16.mxu1 %v1931_v50 }
 0xc02   : > { %v2525_v54 = vunpack.i.h.bf16 %v2523_v31  ;;  %v2524_v55 = vunpack.i.l.bf16 %v2523_v31  ;;  %1934 = vmatpush1.bf16.msra.mxu1 %v1933_v1  ;;  %v1591_v58 = vsel %vm337_vm11, %v2514_v52, %v2515_v51 }
 0xc03   : > { %v2528_v47 = vpop.permute.xlu1 %2527  ;;  %v1935_v59 = vpack.c.bf16 %v1591_v58, %v1589_v57 }
 0xc04   : > { %v1588_v61 = vsel %vm337_vm11, %v2524_v55, %v2519_v42  ;;  %v1590_v62 = vsel %vm337_vm11, %v2525_v54, %v2514_v52  ;;  %v2530_v63 = vunpack.i.h.bf16 %v2528_v47  ;;  %v2529_v44 = vunpack.i.l.bf16 %v2528_v47 }
 0xc05   : > { %v1937_v43 = vpack.c.bf16 %v1590_v62, %v1588_v61  ;;  %v2538_v28 = vpop.permute.xlu0 %2537  ;;  %1936 = vmatprep.subr.bf16.mxu1 %v1935_v59 }
 0xc06   : > { %v1602_v2 = vsel %vm314_vm10, %v2510_v32, %v2529_v44  ;;  %v1603_v3 = vsel %vm314_vm10, %v2500_v23, %v2530_v63  ;;  %v2540_v6 = vunpack.i.h.bf16 %v2538_v28  ;;  %v2539_v7 = vunpack.i.l.bf16 %v2538_v28 }
 0xc07   : > { %v2533_v56 = vpop.permute.xlu1 %2532  ;;  %1938 = vmatpush1.bf16.msra.mxu1 %v1937_v43  ;;  %v1943_v14 = vpack.c.bf16 %v1603_v3, %v1602_v2 }
 0xc08   : > { %v2535_v18 = vunpack.i.h.bf16 %v2533_v56  ;;  %v2534_v4 = vunpack.i.l.bf16 %v2533_v56  ;;  %1940 = vmatprep.subr.bf16.mxu1 %v1939_v53  ;;  %v1625_v11 = vsel %vm337_vm11, %v2539_v7, %v2540_v6 }
 0xc09   : > { %v2543_v45 = vpop.permute.xlu0 %2542 }
 0xc0a   : > { %v2545_v19 = vunpack.i.h.bf16 %v2543_v45  ;;  %v2544_v60 = vunpack.i.l.bf16 %v2543_v45  ;;  %v1627_v12 = vsel %vm337_vm11, %v2534_v4, %v2535_v18 }
 0xc0b   : > { %1942 = vmatpush1.bf16.msra.mxu1 %v1941_v15  ;;  %v1947_v16 = vpack.c.bf16 %v1627_v12, %v1625_v11 }
 0xc0c   : > { %1944 = vmatprep.subr.bf16.mxu1 %v1943_v14  ;;  %v1624_v24 = vsel %vm337_vm11, %v2544_v60, %v2539_v7  ;;  %v1626_v37 = vsel %vm337_vm11, %v2545_v19, %v2534_v4 }
 0xc0d   : > { %v1949_v53 = vpack.c.bf16 %v1626_v37, %v1624_v24 }
 0xc0f   : > { %1946 = vmatpush1.bf16.msra.mxu1 %v1931_v50 }
 0xc10   : > { %1948 = vmatprep.subr.bf16.mxu1 %v1947_v16 }
 0xc13   : > { %1950 = vmatpush1.bf16.msra.mxu1 %v1949_v53 }
 0xc16   : > { %1850 = vmatmul.mubr.msk.f32.vlgmr.msra.gmra.mrb[2].mxu1 %vm533_vm15, %v1847_v17 }
 0xc18   : > { %v1640_v8 = vpop.permute.xlu1 %1639 }
 0xc19   : > { %v1736_v35 = vrot.slane %v1640_v8, 4 }
 0xce9   : > { %v1711_v9 = vpop.f32.mrb[2].mxu1 }
 0xcea   : > { %v1712_v15 = vadd.f32 %v1711_v9, %v1640_v8  ;;  %v1713_v0 = vpop.f32.mrb[3].mxu1 }
 0xceb   : > { %v1714_v5 = vadd.f32 %v1713_v0, %v1640_v8 }
 0xcec   : > { %v1716_v21 = vsel %vm608_vm0, %v1712_v15, 0.0 }
 0xced   : > { %v1717_v10 = vsel %vm608_vm0, %v1714_v5, 0.0 }
 0xcee   : > { %v1718_v13 = vadd.f32 %v1717_v10, %v1716_v21 }
 0xcf0   : > { %1719 = vadd.xlane.f32.xlu0 %v1718_v13 }
 0xd06   : > { %1742 = vperm.xlu0 %2155, %v1849_v29  }
 0xd7d   : > { %v1720_v30 = vpop.xlane.xlu0 %1719 }
 0xd7e   : > { %v1721_v34 = vmul.f32 0.00390625, %v1720_v30 }
 0xd80   : > { %v1722_v22 = vsub.f32 %v1712_v15, %v1721_v34  ;;  %v1723_v39 = vsub.f32 %v1714_v5, %v1721_v34 }
 0xd82   : > { %v1724_v46 = vmul.f32 %v1722_v22, %v1722_v22  ;;  %v1725_v23 = vmul.f32 %v1723_v39, %v1723_v39 }
 0xd84   : > { %v1726_v25 = vsel %vm608_vm0, %v1724_v46, 0.0  ;;  %v1727_v20 = vsel %vm608_vm0, %v1725_v23, 0.0 }
 0xd85   : > { %v1728_v26 = vadd.f32 %v1727_v20, %v1726_v25  ;;  %v1743_v48 = vpop.permute.xlu0 %1742 }
 0xd87   : > { %1729 = vadd.xlane.f32.xlu1 %v1728_v26 }
 0xe14   : > { %v1730_v27 = vpop.xlane.xlu1 %1729 }
 0xe15   : > { %v1731_v32 = vmul.f32 0.00390625, %v1730_v27 }
 0xe17   : > { %v1732_v33 = vadd.f32 1e-05, %v1731_v32 }
 0xe19   : > { %2553 = vrsqrt.f32 %v1732_v33 }
 0xe23   : > { %v2554_v40 = vpop.eup %2553 }
 0xe24   : > { %v1734_v36 = vmul.f32 %v2554_v40, %v1722_v22  ;;  %v1735_v38 = vmul.f32 %v2554_v40, %v1723_v39 }
 0xe26   : > { %v1738_v41 = vmul.f32 %v1736_v35, %v1734_v36  ;;  %v1739_v42 = vmul.f32 %v1736_v35, %v1735_v38 }
 0xe28   : > { %v1745_v1 = vadd.f32 %v1743_v48, %v1738_v41  ;;  %v1746_v49 = vadd.f32 %v1743_v48, %v1739_v42 }
 0xe2a   : > { %v1751_v50 = vrot.slane %v1745_v1, 4  ;;  %v1752_v51 = vrot.slane %v1746_v49, 4  ;;  %vm1747_vm6 = vcmp.ge.f32.partialorder %v1745_v1, 0.0  ;;  %vm1748_vm10 = vcmp.ge.f32.partialorder %v1746_v49, 0.0 }
 0xe2c   : > { %v1755_v52 = vmul.f32 %v1751_v50, %v1743_v48  ;;  %v1756_v31 = vmul.f32 %v1752_v51, %v1743_v48 }
 0xe2e   : > { %v1759_v54 = vrot.slane %v1755_v52, 4  ;;  %v1760_v55 = vrot.slane %v1756_v31, 4 }
 0xe30   : > { %v1763_v57 = vsel %vm1747_vm6, %v1745_v1, %v1759_v54  ;;  %v1764_v58 = vsel %vm1748_vm10, %v1746_v49, %v1760_v55 }
 0xe31   : > { %v1767_v47 = vcombine.low %v1763_v57, %v1764_v58 }
 0xe33   : > { %1769 = vst [vmem:[%s170_s11] sm:$0xff] %v1767_v47 }
 0xe34 PF: > { %s13_s12 = sadd.s32 1, %s2564_s12  }
 0xe35   : > { %p10_p4 = scmp.ge.s32.totalorder %s13_s12, 4  }
 0xe37   :  { %12 = sbr.rel (!%p10_p4) target bundleno = 1 (0x1), region = 68 }

</bundles_post_ra>
